<compile_context>
chip_gen: v7x
topology: tpu7x:2x2x1
jax: 0.10.0
libtpu: 0.0.40
codegen_flags: <defaults>
</compile_context>

<pallas_src>
import numpy as np
import jax
import jax.numpy as jnp
from jax.experimental import pallas as pl
from jax.experimental.pallas import tpu as pltpu


def _round_up(x, m):
    return ((x + m - 1) // m) * m


def _gru_vmem_bytes(T, Bblk, Ep, Hp):
    """Estimated per-core VMEM footprint of one GRU batch block (bytes)."""
    G = 3 * Hp
    tb = T * Bblk
    x_b = 2 * tb * Ep * 2          # bf16 X block, double-buffered
    hs_b = 2 * tb * Hp * 2         # bf16 hidden-state block, double-buffered
    gx_b = tb * G * 4              # f32 gx scratch
    w_b = 2 * (Ep * G + Hp * G) * 2  # bf16 weights, double-buffered
    bias_b = 2 * 2 * G * 4
    return x_b + hs_b + gx_b + w_b + bias_b


def _pick_batch_block(T, Bp, Ep, Hp, budget=40 * 1024 * 1024):
    """Largest batch block (multiple of 8, divides Bp) fitting the VMEM budget."""
    for c in (256, 128, 64, 32, 16, 8):
        if Bp % c == 0 and _gru_vmem_bytes(T, c, Ep, Hp) <= budget:
            return c
    return 8


# ----------------------------------------------------------------------------
# Kernel 1: batched input projection + sequential GRU recurrence (per batch block).
# ----------------------------------------------------------------------------
def make_gru_kernel(T, Bblk, unroll):
    def gru_kernel(x_ref, w_ih_ref, w_hh_ref, b_ih_ref, b_hh_ref,
                   hs_ref, gx_ref):
        Hp = hs_ref.shape[-1]

        # (1) Whole-block input projection, hoisted out of the recurrence:
        #     one (T*Bblk, Ep) x (Ep, 3Hp) bf16 MXU matmul, f32 accumulation.
        gx_ref[...] = (jnp.dot(x_ref[...], w_ih_ref[...],
                               preferred_element_type=jnp.float32)
                       + b_ih_ref[...])

        # Grid-invariant recurrent weights/bias, hoisted out of the loop.
        # TODO(synk): pipeline_mode=pl.Buffered(1) on the weight BlockSpecs would
        # drop their second pipeline buffer; kept default for portability.
        w_hh = w_hh_ref[...]                       # bf16 (Hp, 3Hp)
        b_hh = b_hh_ref[...]                       # f32  (1, 3Hp)

        # (2) Sequential recurrence: only gh = h @ W_hh stays in the loop.
        #     Gate elementwise math stays f32 (v5e has no bf16 VALU/EUP path).
        def step(t, h):
            row = pl.multiple_of(t * Bblk, 8)
            gx = gx_ref[pl.ds(row, Bblk), :]                      # (Bblk, 3Hp) f32
            gh = jnp.dot(h.astype(jnp.bfloat16), w_hh,
                         preferred_element_type=jnp.float32) + b_hh
            rz = jax.nn.sigmoid(gx[:, :2 * Hp] + gh[:, :2 * Hp])  # fused r|z
            r = rz[:, :Hp]
            z = rz[:, Hp:]
            n = jnp.tanh(gx[:, 2 * Hp:] + r * gh[:, 2 * Hp:])
            h_new = (1.0 - z) * n + z * h
            hs_ref[pl.ds(row, Bblk), :] = h_new.astype(jnp.bfloat16)
            return h_new

        jax.lax.fori_loop(0, T, step, jnp.zeros((Bblk, Hp), jnp.float32),
                          unroll=unroll)

    return gru_kernel


def gru_recurrence_pallas(x_blk, w_ih, w_hh, b_ih, b_hh, Bblk, unroll):
    """x_blk: (NB, T*Bblk, Ep) bf16 -> hidden states (NB, T*Bblk, Hp) bf16."""
    NB, TB, Ep = x_blk.shape
    T = TB // Bblk
    Hp = w_hh.shape[0]
    G = 3 * Hp
    need = _gru_vmem_bytes(T, Bblk, Ep, Hp)
    vmem_limit = int(min(max(need * 1.3 + (4 << 20), 32 << 20), 128 << 20))
    return pl.pallas_call(
        make_gru_kernel(T, Bblk, unroll),
        out_shape=jax.ShapeDtypeStruct((NB, TB, Hp), jnp.bfloat16),
        grid_spec=pltpu.PrefetchScalarGridSpec(
            num_scalar_prefetch=0,
            grid=(NB,),                                          # batch blocks
            in_specs=[
                pl.BlockSpec((None, TB, Ep), lambda i: (i, 0, 0)),  # X block
                pl.BlockSpec((Ep, G), lambda i: (0, 0)),            # W_ih (gate-aligned)
                pl.BlockSpec((Hp, G), lambda i: (0, 0)),            # W_hh (gate-aligned)
                pl.BlockSpec((1, G), lambda i: (0, 0)),             # b_ih
                pl.BlockSpec((1, G), lambda i: (0, 0)),             # b_hh
            ],
            out_specs=pl.BlockSpec((None, TB, Hp), lambda i: (i, 0, 0)),
            scratch_shapes=[pltpu.VMEM((TB, G), jnp.float32)],       # gx for all T
        ),
        compiler_params=pltpu.CompilerParams(
            dimension_semantics=("parallel",),                       # megacore on v7x
            vmem_limit_bytes=vmem_limit),
    )(x_blk, w_ih, w_hh, b_ih, b_hh)


# ----------------------------------------------------------------------------
# Kernel 2: packed vocab projection (M, H) x (H, V), tiled over M and V.
# ----------------------------------------------------------------------------
def vocab_proj_kernel(h_ref, w_ref, b_ref, out_ref):
    out_ref[...] = (jnp.dot(h_ref[...], w_ref[...],
                            preferred_element_type=jnp.float32)
                    + b_ref[...])


def vocab_projection_pallas(hs2, w_out, b_out):
    """hs2: (M, Hp) bf16 (already packed), w_out: (Hp, Vp) bf16 -> (M, Vp) f32."""
    M, Hp = hs2.shape
    Vp = w_out.shape[1]
    tn = next(c for c in (1024, 512, 256, 128) if Vp % c == 0)
    tm = 512 if (M % 512 == 0 and M > 512) else M
    need = 2 * (tm * Hp * 2 + Hp * tn * 2 + tn * 4 + tm * tn * 4)
    vmem_limit = int(min(max(need * 1.3 + (4 << 20), 32 << 20), 128 << 20))
    return pl.pallas_call(
        vocab_proj_kernel,
        out_shape=jax.ShapeDtypeStruct((M, Vp), jnp.float32),
        grid_spec=pltpu.PrefetchScalarGridSpec(
            num_scalar_prefetch=0,
            grid=(M // tm, Vp // tn),
            in_specs=[
                pl.BlockSpec((tm, Hp), lambda i, j: (i, 0)),   # hs tile (resident over j)
                pl.BlockSpec((Hp, tn), lambda i, j: (0, j)),   # W_out tile
                pl.BlockSpec((1, tn), lambda i, j: (0, j)),    # b_out tile
            ],
            out_specs=pl.BlockSpec((tm, tn), lambda i, j: (i, j)),
        ),
        compiler_params=pltpu.CompilerParams(
            dimension_semantics=("parallel", "parallel"),
            vmem_limit_bytes=vmem_limit),
    )(hs2, w_out, b_out)


# ----------------------------------------------------------------------------
# One-time parameter preparation (hoisted out of the per-call forward path).
# ----------------------------------------------------------------------------
def prepare_params(params):
    E = params["w_ih"].shape[0]
    H = params["w_hh"].shape[0]
    V = params["w_out"].shape[1]
    Ep = _round_up(E, 128)
    Hp = _round_up(H, 128)
    Vp = _round_up(V, 512)                      # tile-friendly, lane-dense stores

    w_ih = np.asarray(params["w_ih"], np.float32)
    w_hh = np.asarray(params["w_hh"], np.float32)
    b_ih = np.asarray(params["b_ih"], np.float32)
    b_hh = np.asarray(params["b_hh"], np.float32)

    # Each GRU gate block [r|z|n] is remapped so its slice starts at a
    # 128-aligned lane offset inside the padded 3*Hp axis.
    w_ih_p = np.zeros((Ep, 3 * Hp), np.float32)
    w_hh_p = np.zeros((Hp, 3 * Hp), np.float32)
    b_ih_p = np.zeros((1, 3 * Hp), np.float32)
    b_hh_p = np.zeros((1, 3 * Hp), np.float32)
    for g in range(3):
        w_ih_p[:E, g * Hp:g * Hp + H] = w_ih[:, g * H:(g + 1) * H]
        w_hh_p[:H, g * Hp:g * Hp + H] = w_hh[:, g * H:(g + 1) * H]
        b_ih_p[:, g * Hp:g * Hp + H] = b_ih[:, g * H:(g + 1) * H]
        b_hh_p[:, g * Hp:g * Hp + H] = b_hh[:, g * H:(g + 1) * H]

    w_out_p = np.zeros((Hp, Vp), np.float32)
    w_out_p[:H, :V] = np.asarray(params["w_out"], np.float32)
    b_out_p = np.zeros((1, Vp), np.float32)
    b_out_p[:, :V] = np.asarray(params["b_out"], np.float32)

    return {
        "E": E, "H": H, "V": V, "Ep": Ep, "Hp": Hp, "Vp": Vp,
        "embeddings": jnp.asarray(params["embeddings"], jnp.float32),
        # bf16 matmul operands (f32 accumulation in-kernel); zero padding is
        # exact in bf16, so the padded-H-lane invariant is preserved.
        "w_ih": jnp.asarray(w_ih_p).astype(jnp.bfloat16),
        "w_hh": jnp.asarray(w_hh_p).astype(jnp.bfloat16),
        "w_out": jnp.asarray(w_out_p).astype(jnp.bfloat16),
        "b_ih": jnp.asarray(b_ih_p),
        "b_hh": jnp.asarray(b_hh_p),
        "b_out": jnp.asarray(b_out_p),
    }


# ----------------------------------------------------------------------------
# Model forward: embedding, concat, batch-block layout, pack-then-project.
# ----------------------------------------------------------------------------
def rnn_show_tell_forward(prepared, features, captions, lengths):
    """
    features: (B, E) float32
    captions: (B, S) int32
    lengths:  python list of ints (sorted descending, as pack_padded_sequence requires)
    returns:  (sum(lengths), V) float32
    """
    p = prepared
    E, H, V = p["E"], p["H"], p["V"]
    Ep, Hp, Vp = p["Ep"], p["Hp"], p["Vp"]

    # Plain-JAX glue: embedding lookup + feature concat (gather has no clean
    # Pallas equivalent worth a custom DMA kernel here).
    emb = jnp.take(p["embeddings"], captions, axis=0)                  # (B, S, E)
    inputs = jnp.concatenate(
        [features[:, None, :].astype(jnp.float32), emb], axis=1)       # (B, T, E)
    B, T, _ = inputs.shape

    Bp = _round_up(B, 8)
    Bblk = _pick_batch_block(T, Bp, Ep, Hp)
    NB = Bp // Bblk
    unroll = True if T <= 16 else 8

    # Pad + lay out as (NB, T*Bblk, Ep): within a block, rows are time-major
    # so the recurrence reads a contiguous (Bblk, 3Hp) slab per step.
    x_p = jnp.zeros((Bp, T, Ep), jnp.float32).at[:B, :, :E].set(inputs)
    x_blk = (x_p.astype(jnp.bfloat16)
             .reshape(NB, Bblk, T, Ep)
             .transpose(0, 2, 1, 3)
             .reshape(NB, T * Bblk, Ep))

    hs_blk = gru_recurrence_pallas(x_blk, p["w_ih"], p["w_hh"],
                                   p["b_ih"], p["b_hh"], Bblk, unroll)  # (NB, T*Bblk, Hp) bf16

    # Pack BEFORE the vocab projection (pack_padded_sequence order:
    # timestep-major, only batches with length > t).  Only sum(lengths) rows
    # reach the big matmul; no full (T*B, V) logits tensor is materialized.
    # TODO(synk): with device-side lengths, build these indices from a mask to
    # avoid a retrace per distinct length pattern.
    pack_idx = []
    for t in range(T):
        for b in range(B):
            if lengths[b] > t:
                i, bb = divmod(b, Bblk)
                pack_idx.append(i * T * Bblk + t * Bblk + bb)
    M = len(pack_idx)
    tm_target = 512
    Mp = _round_up(M, 8)
    if Mp > tm_target:
        Mp = _round_up(Mp, tm_target)
    pack_idx = jnp.asarray(pack_idx + [0] * (Mp - M), jnp.int32)

    hs_packed = jnp.take(hs_blk.reshape(NB * T * Bblk, Hp), pack_idx, axis=0)  # (Mp, Hp) bf16
    logits = vocab_projection_pallas(hs_packed, p["w_out"], p["b_out"])        # (Mp, Vp) f32
    return logits[:M, :V]


# ----------------------------------------------------------------------------
# Pure-JAX references (silent correctness checks).
# ----------------------------------------------------------------------------
def gru_decode_ref(inputs_bte, prm, bf16):
    """inputs: (B, T, E) f32. Returns (T, B, V) logits. bf16=True mimics the
    kernel path (bf16 matmul operands, f32 accumulation, bf16 stored hiddens)."""
    w_ih, w_hh = prm["w_ih"], prm["w_hh"]
    H = w_hh.shape[0]
    cast = (lambda a: a.astype(jnp.bfloat16)) if bf16 else (lambda a: a)
    wih, whh = cast(w_ih), cast(w_hh)
    x_tm = jnp.transpose(inputs_bte, (1, 0, 2))

    def step(h, x_t):
        gx = jnp.dot(cast(x_t), wih, preferred_element_type=jnp.float32) + prm["b_ih"]
        gh = jnp.dot(cast(h), whh, preferred_element_type=jnp.float32) + prm["b_hh"]
        r = jax.nn.sigmoid(gx[:, :H] + gh[:, :H])
        z = jax.nn.sigmoid(gx[:, H:2 * H] + gh[:, H:2 * H])
        n = jnp.tanh(gx[:, 2 * H:] + r * gh[:, 2 * H:])
        h_new = (1.0 - z) * n + z * h
        return h_new, cast(h_new)

    h0 = jnp.zeros((x_tm.shape[1], H), jnp.float32)
    _, hs = jax.lax.scan(step, h0, x_tm)                       # (T, B, H)
    return (jnp.dot(cast(hs), cast(prm["w_out"]),
                    preferred_element_type=jnp.float32) + prm["b_out"])


if __name__ == "__main__":
    # Small shapes consistent with the module.
    B, S, E, H, V = 2, 8, 16, 32, 40
    T = S + 1                              # features prepended as first timestep
    lengths = [9, 6]                       # sorted descending, <= T

    key = jax.random.PRNGKey(0)
    ks = jax.random.split(key, 9)
    scale = 0.1
    raw_params = {
        "embeddings": scale * jax.random.normal(ks[0], (V, E), jnp.float32),
        "w_ih":       scale * jax.random.normal(ks[1], (E, 3 * H), jnp.float32),
        "w_hh":       scale * jax.random.normal(ks[2], (H, 3 * H), jnp.float32),
        "b_ih":       scale * jax.random.normal(ks[3], (1, 3 * H), jnp.float32),
        "b_hh":       scale * jax.random.normal(ks[4], (1, 3 * H), jnp.float32),
        "w_out":      scale * jax.random.normal(ks[5], (H, V), jnp.float32),
        "b_out":      scale * jax.random.normal(ks[6], (1, V), jnp.float32),
    }
    features = jax.random.normal(ks[7], (B, E), jnp.float32)
    captions = jax.random.randint(ks[8], (B, S), 0, V, dtype=jnp.int32)

    prepared = prepare_params(raw_params)   # hoisted: runs once, not per call
    out = rnn_show_tell_forward(prepared, features, captions, lengths)
    out = jax.block_until_ready(out)
    assert out.shape == (sum(lengths), V)

    # Silent numerical checks against pure-JAX references.
    emb = jnp.take(raw_params["embeddings"], captions, axis=0)
    inputs = jnp.concatenate([features[:, None, :], emb], axis=1)       # (B, T, E)
    t_idx, b_idx = [], []
    for t in range(T):
        for b in range(B):
            if lengths[b] > t:
                t_idx.append(t)
                b_idx.append(b)
    t_idx = jnp.asarray(t_idx, jnp.int32)
    b_idx = jnp.asarray(b_idx, jnp.int32)

    # (a) mechanical check vs a reference that mimics the bf16 matmul path.
    ref_bf16 = gru_decode_ref(inputs, raw_params, bf16=True)[t_idx, b_idx]
    np.testing.assert_allclose(np.asarray(out), np.asarray(ref_bf16),
                               rtol=2e-3, atol=2e-3)
    # (b) semantic sanity vs the full-f32 module (bf16 precision tolerance).
    ref_f32 = gru_decode_ref(inputs, raw_params, bf16=False)[t_idx, b_idx]
    np.testing.assert_allclose(np.asarray(out), np.asarray(ref_f32),
                               rtol=5e-2, atol=5e-2)

    print("KERNEL_OK")
</pallas_src>

<mosaic_0001>
module attributes {stable_mosaic.version = 11 : i64} {
  func.func @gru_kernel(%arg0: i32, %arg1: memref<1x72x128xbf16, #tpu.memory_space<vmem>>, %arg2: memref<128x384xbf16, #tpu.memory_space<vmem>>, %arg3: memref<128x384xbf16, #tpu.memory_space<vmem>>, %arg4: memref<1x384xf32, #tpu.memory_space<vmem>>, %arg5: memref<1x384xf32, #tpu.memory_space<vmem>>, %arg6: memref<1x72x128xbf16, #tpu.memory_space<vmem>>, %arg7: memref<72x384xf32, #tpu.memory_space<vmem>>) attributes {dimension_semantics = [#tpu.dimension_semantics<parallel>], iteration_bounds = array<i64: 1>, scalar_prefetch = 0 : i64, scratch_operands = 1 : i64, tpu.core_type = #tpu.core_type<tc>, window_params = [{transform_indices = @transform_0, window_bounds = array<i64: 1, 72, 128>}, {pipeline_mode = #tpu.pipeline_mode<synchronous>, transform_indices = @transform_1, window_bounds = array<i64: 128, 384>}, {pipeline_mode = #tpu.pipeline_mode<synchronous>, transform_indices = @transform_2, window_bounds = array<i64: 128, 384>}, {pipeline_mode = #tpu.pipeline_mode<synchronous>, transform_indices = @transform_3, window_bounds = array<i64: 1, 384>}, {pipeline_mode = #tpu.pipeline_mode<synchronous>, transform_indices = @transform_4, window_bounds = array<i64: 1, 384>}, {transform_indices = @transform_5, window_bounds = array<i64: 1, 72, 128>}]} {
    %c0 = arith.constant 0 : index
    %c0_0 = arith.constant 0 : index
    %c0_1 = arith.constant 0 : index
    %0 = vector.load %arg1[%c0, %c0_0, %c0_1] : memref<1x72x128xbf16, #tpu.memory_space<vmem>>, vector<1x72x128xbf16>
    %1 = vector.shape_cast %0 : vector<1x72x128xbf16> to vector<72x128xbf16>
    %c0_2 = arith.constant 0 : index
    %c0_3 = arith.constant 0 : index
    %2 = vector.load %arg2[%c0_2, %c0_3] : memref<128x384xbf16, #tpu.memory_space<vmem>>, vector<128x384xbf16>
    %cst = arith.constant dense<0.000000e+00> : vector<72x384xf32>
    %3 = tpu.matmul %1, %2, %cst {dimension_numbers = #tpu.dot_dimension_numbers<[1], [0], [0], [1], [0, 0, 1, 1], [], []>} : vector<72x128xbf16>, vector<128x384xbf16>, vector<72x384xf32> -> vector<72x384xf32>
    %c0_4 = arith.constant 0 : index
    %c0_5 = arith.constant 0 : index
    %4 = vector.load %arg4[%c0_4, %c0_5] : memref<1x384xf32, #tpu.memory_space<vmem>>, vector<1x384xf32>
    %5 = vector.broadcast %4 : vector<1x384xf32> to vector<72x384xf32>
    %6 = arith.addf %3, %5 : vector<72x384xf32>
    %c0_6 = arith.constant 0 : index
    %c0_7 = arith.constant 0 : index
    %7 = vector.load %arg7[%c0_6, %c0_7] : memref<72x384xf32, #tpu.memory_space<vmem>>, vector<72x384xf32>
    tpu.vector_store %arg7[%c0_6, %c0_7], %6 {strides = array<i32>} : memref<72x384xf32, #tpu.memory_space<vmem>>, vector<72x384xf32>,
    %c0_8 = arith.constant 0 : index
    %c0_9 = arith.constant 0 : index
    %8 = vector.load %arg3[%c0_8, %c0_9] : memref<128x384xbf16, #tpu.memory_space<vmem>>, vector<128x384xbf16>
    %c0_10 = arith.constant 0 : index
    %c0_11 = arith.constant 0 : index
    %9 = vector.load %arg5[%c0_10, %c0_11] : memref<1x384xf32, #tpu.memory_space<vmem>>, vector<1x384xf32>
    %cst_12 = arith.constant 0.000000e+00 : f32
    %10 = vector.broadcast %cst_12 : f32 to vector<8x128xf32>
    %c0_i32 = arith.constant 0 : i32
    %c8_i32 = arith.constant 8 : i32
    %11 = arith.muli %c0_i32, %c8_i32 : i32
    %12 = tpu.assume_multiple %11, 8 : i32
    %13 = arith.index_cast %12 : i32 to index
    %c0_13 = arith.constant 0 : index
    %14 = vector.load %arg7[%13, %c0_13] : memref<72x384xf32, #tpu.memory_space<vmem>>, vector<8x384xf32>
    %15 = arith.truncf %10 : vector<8x128xf32> to vector<8x128xbf16>
    %cst_14 = arith.constant dense<0.000000e+00> : vector<8x384xf32>
    %16 = tpu.matmul %15, %8, %cst_14 {dimension_numbers = #tpu.dot_dimension_numbers<[1], [0], [0], [1], [0, 0, 1, 1], [], []>} : vector<8x128xbf16>, vector<128x384xbf16>, vector<8x384xf32> -> vector<8x384xf32>
    %17 = vector.broadcast %9 : vector<1x384xf32> to vector<8x384xf32>
    %18 = arith.addf %16, %17 : vector<8x384xf32>
    %19 = vector.extract_strided_slice %14 {offsets = [0, 0], sizes = [8, 256], strides = [1, 1]} : vector<8x384xf32> to vector<8x256xf32>
    %20 = vector.extract_strided_slice %18 {offsets = [0, 0], sizes = [8, 256], strides = [1, 1]} : vector<8x384xf32> to vector<8x256xf32>
    %21 = arith.addf %19, %20 : vector<8x256xf32>
    %22 = arith.negf %21 : vector<8x256xf32>
    %23 = math.exp %22 : vector<8x256xf32>
    %cst_15 = arith.constant 1.000000e+00 : f32
    %24 = vector.broadcast %cst_15 : f32 to vector<8x256xf32>
    %25 = arith.addf %24, %23 : vector<8x256xf32>
    %26 = arith.divf %24, %25 : vector<8x256xf32>
    %27 = vector.extract_strided_slice %26 {offsets = [0, 0], sizes = [8, 128], strides = [1, 1]} : vector<8x256xf32> to vector<8x128xf32>
    %28 = vector.extract_strided_slice %26 {offsets = [0, 128], sizes = [8, 128], strides = [1, 1]} : vector<8x256xf32> to vector<8x128xf32>
    %29 = vector.extract_strided_slice %14 {offsets = [0, 256], sizes = [8, 128], strides = [1, 1]} : vector<8x384xf32> to vector<8x128xf32>
    %30 = vector.extract_strided_slice %18 {offsets = [0, 256], sizes = [8, 128], strides = [1, 1]} : vector<8x384xf32> to vector<8x128xf32>
    %31 = arith.mulf %27, %30 : vector<8x128xf32>
    %32 = arith.addf %29, %31 : vector<8x128xf32>
    %33 = math.tanh %32 : vector<8x128xf32>
    %cst_16 = arith.constant 1.000000e+00 : f32
    %34 = vector.broadcast %cst_16 : f32 to vector<8x128xf32>
    %35 = arith.subf %34, %28 : vector<8x128xf32>
    %36 = arith.mulf %35, %33 : vector<8x128xf32>
    %37 = arith.mulf %28, %10 : vector<8x128xf32>
    %38 = arith.addf %36, %37 : vector<8x128xf32>
    %39 = arith.truncf %38 : vector<8x128xf32> to vector<8x128xbf16>
    %c0_17 = arith.constant 0 : index
    %40 = arith.index_cast %12 : i32 to index
    %c0_18 = arith.constant 0 : index
    %41 = vector.load %arg6[%c0_17, %40, %c0_18] : memref<1x72x128xbf16, #tpu.memory_space<vmem>>, vector<1x8x128xbf16>
    %42 = vector.shape_cast %41 : vector<1x8x128xbf16> to vector<8x128xbf16>
    %43 = vector.shape_cast %39 : vector<8x128xbf16> to vector<1x8x128xbf16>
    tpu.vector_store %arg6[%c0_17, %40, %c0_18], %43 {strides = array<i32>} : memref<1x72x128xbf16, #tpu.memory_space<vmem>>, vector<1x8x128xbf16>,
    %c1_i32 = arith.constant 1 : i32
    %c8_i32_19 = arith.constant 8 : i32
    %44 = arith.muli %c1_i32, %c8_i32_19 : i32
    %45 = tpu.assume_multiple %44, 8 : i32
    %46 = arith.index_cast %45 : i32 to index
    %c0_20 = arith.constant 0 : index
    %47 = vector.load %arg7[%46, %c0_20] : memref<72x384xf32, #tpu.memory_space<vmem>>, vector<8x384xf32>
    %48 = arith.truncf %38 : vector<8x128xf32> to vector<8x128xbf16>
    %cst_21 = arith.constant dense<0.000000e+00> : vector<8x384xf32>
    %49 = tpu.matmul %48, %8, %cst_21 {dimension_numbers = #tpu.dot_dimension_numbers<[1], [0], [0], [1], [0, 0, 1, 1], [], []>} : vector<8x128xbf16>, vector<128x384xbf16>, vector<8x384xf32> -> vector<8x384xf32>
    %50 = vector.broadcast %9 : vector<1x384xf32> to vector<8x384xf32>
    %51 = arith.addf %49, %50 : vector<8x384xf32>
    %52 = vector.extract_strided_slice %47 {offsets = [0, 0], sizes = [8, 256], strides = [1, 1]} : vector<8x384xf32> to vector<8x256xf32>
    %53 = vector.extract_strided_slice %51 {offsets = [0, 0], sizes = [8, 256], strides = [1, 1]} : vector<8x384xf32> to vector<8x256xf32>
    %54 = arith.addf %52, %53 : vector<8x256xf32>
    %55 = arith.negf %54 : vector<8x256xf32>
    %56 = math.exp %55 : vector<8x256xf32>
    %cst_22 = arith.constant 1.000000e+00 : f32
    %57 = vector.broadcast %cst_22 : f32 to vector<8x256xf32>
    %58 = arith.addf %57, %56 : vector<8x256xf32>
    %59 = arith.divf %57, %58 : vector<8x256xf32>
    %60 = vector.extract_strided_slice %59 {offsets = [0, 0], sizes = [8, 128], strides = [1, 1]} : vector<8x256xf32> to vector<8x128xf32>
    %61 = vector.extract_strided_slice %59 {offsets = [0, 128], sizes = [8, 128], strides = [1, 1]} : vector<8x256xf32> to vector<8x128xf32>
    %62 = vector.extract_strided_slice %47 {offsets = [0, 256], sizes = [8, 128], strides = [1, 1]} : vector<8x384xf32> to vector<8x128xf32>
    %63 = vector.extract_strided_slice %51 {offsets = [0, 256], sizes = [8, 128], strides = [1, 1]} : vector<8x384xf32> to vector<8x128xf32>
    %64 = arith.mulf %60, %63 : vector<8x128xf32>
    %65 = arith.addf %62, %64 : vector<8x128xf32>
    %66 = math.tanh %65 : vector<8x128xf32>
    %cst_23 = arith.constant 1.000000e+00 : f32
    %67 = vector.broadcast %cst_23 : f32 to vector<8x128xf32>
    %68 = arith.subf %67, %61 : vector<8x128xf32>
    %69 = arith.mulf %68, %66 : vector<8x128xf32>
    %70 = arith.mulf %61, %38 : vector<8x128xf32>
    %71 = arith.addf %69, %70 : vector<8x128xf32>
    %72 = arith.truncf %71 : vector<8x128xf32> to vector<8x128xbf16>
    %c0_24 = arith.constant 0 : index
    %73 = arith.index_cast %45 : i32 to index
    %c0_25 = arith.constant 0 : index
    %74 = vector.load %arg6[%c0_24, %73, %c0_25] : memref<1x72x128xbf16, #tpu.memory_space<vmem>>, vector<1x8x128xbf16>
    %75 = vector.shape_cast %74 : vector<1x8x128xbf16> to vector<8x128xbf16>
    %76 = vector.shape_cast %72 : vector<8x128xbf16> to vector<1x8x128xbf16>
    tpu.vector_store %arg6[%c0_24, %73, %c0_25], %76 {strides = array<i32>} : memref<1x72x128xbf16, #tpu.memory_space<vmem>>, vector<1x8x128xbf16>,
    %c2_i32 = arith.constant 2 : i32
    %c8_i32_26 = arith.constant 8 : i32
    %77 = arith.muli %c2_i32, %c8_i32_26 : i32
    %78 = tpu.assume_multiple %77, 8 : i32
    %79 = arith.index_cast %78 : i32 to index
    %c0_27 = arith.constant 0 : index
    %80 = vector.load %arg7[%79, %c0_27] : memref<72x384xf32, #tpu.memory_space<vmem>>, vector<8x384xf32>
    %81 = arith.truncf %71 : vector<8x128xf32> to vector<8x128xbf16>
    %cst_28 = arith.constant dense<0.000000e+00> : vector<8x384xf32>
    %82 = tpu.matmul %81, %8, %cst_28 {dimension_numbers = #tpu.dot_dimension_numbers<[1], [0], [0], [1], [0, 0, 1, 1], [], []>} : vector<8x128xbf16>, vector<128x384xbf16>, vector<8x384xf32> -> vector<8x384xf32>
    %83 = vector.broadcast %9 : vector<1x384xf32> to vector<8x384xf32>
    %84 = arith.addf %82, %83 : vector<8x384xf32>
    %85 = vector.extract_strided_slice %80 {offsets = [0, 0], sizes = [8, 256], strides = [1, 1]} : vector<8x384xf32> to vector<8x256xf32>
    %86 = vector.extract_strided_slice %84 {offsets = [0, 0], sizes = [8, 256], strides = [1, 1]} : vector<8x384xf32> to vector<8x256xf32>
    %87 = arith.addf %85, %86 : vector<8x256xf32>
    %88 = arith.negf %87 : vector<8x256xf32>
    %89 = math.exp %88 : vector<8x256xf32>
    %cst_29 = arith.constant 1.000000e+00 : f32
    %90 = vector.broadcast %cst_29 : f32 to vector<8x256xf32>
    %91 = arith.addf %90, %89 : vector<8x256xf32>
    %92 = arith.divf %90, %91 : vector<8x256xf32>
    %93 = vector.extract_strided_slice %92 {offsets = [0, 0], sizes = [8, 128], strides = [1, 1]} : vector<8x256xf32> to vector<8x128xf32>
    %94 = vector.extract_strided_slice %92 {offsets = [0, 128], sizes = [8, 128], strides = [1, 1]} : vector<8x256xf32> to vector<8x128xf32>
    %95 = vector.extract_strided_slice %80 {offsets = [0, 256], sizes = [8, 128], strides = [1, 1]} : vector<8x384xf32> to vector<8x128xf32>
    %96 = vector.extract_strided_slice %84 {offsets = [0, 256], sizes = [8, 128], strides = [1, 1]} : vector<8x384xf32> to vector<8x128xf32>
    %97 = arith.mulf %93, %96 : vector<8x128xf32>
    %98 = arith.addf %95, %97 : vector<8x128xf32>
    %99 = math.tanh %98 : vector<8x128xf32>
    %cst_30 = arith.constant 1.000000e+00 : f32
    %100 = vector.broadcast %cst_30 : f32 to vector<8x128xf32>
    %101 = arith.subf %100, %94 : vector<8x128xf32>
    %102 = arith.mulf %101, %99 : vector<8x128xf32>
    %103 = arith.mulf %94, %71 : vector<8x128xf32>
    %104 = arith.addf %102, %103 : vector<8x128xf32>
    %105 = arith.truncf %104 : vector<8x128xf32> to vector<8x128xbf16>
    %c0_31 = arith.constant 0 : index
    %106 = arith.index_cast %78 : i32 to index
    %c0_32 = arith.constant 0 : index
    %107 = vector.load %arg6[%c0_31, %106, %c0_32] : memref<1x72x128xbf16, #tpu.memory_space<vmem>>, vector<1x8x128xbf16>
    %108 = vector.shape_cast %107 : vector<1x8x128xbf16> to vector<8x128xbf16>
    %109 = vector.shape_cast %105 : vector<8x128xbf16> to vector<1x8x128xbf16>
    tpu.vector_store %arg6[%c0_31, %106, %c0_32], %109 {strides = array<i32>} : memref<1x72x128xbf16, #tpu.memory_space<vmem>>, vector<1x8x128xbf16>,
    %c3_i32 = arith.constant 3 : i32
    %c8_i32_33 = arith.constant 8 : i32
    %110 = arith.muli %c3_i32, %c8_i32_33 : i32
    %111 = tpu.assume_multiple %110, 8 : i32
    %112 = arith.index_cast %111 : i32 to index
    %c0_34 = arith.constant 0 : index
    %113 = vector.load %arg7[%112, %c0_34] : memref<72x384xf32, #tpu.memory_space<vmem>>, vector<8x384xf32>
    %114 = arith.truncf %104 : vector<8x128xf32> to vector<8x128xbf16>
    %cst_35 = arith.constant dense<0.000000e+00> : vector<8x384xf32>
    %115 = tpu.matmul %114, %8, %cst_35 {dimension_numbers = #tpu.dot_dimension_numbers<[1], [0], [0], [1], [0, 0, 1, 1], [], []>} : vector<8x128xbf16>, vector<128x384xbf16>, vector<8x384xf32> -> vector<8x384xf32>
    %116 = vector.broadcast %9 : vector<1x384xf32> to vector<8x384xf32>
    %117 = arith.addf %115, %116 : vector<8x384xf32>
    %118 = vector.extract_strided_slice %113 {offsets = [0, 0], sizes = [8, 256], strides = [1, 1]} : vector<8x384xf32> to vector<8x256xf32>
    %119 = vector.extract_strided_slice %117 {offsets = [0, 0], sizes = [8, 256], strides = [1, 1]} : vector<8x384xf32> to vector<8x256xf32>
    %120 = arith.addf %118, %119 : vector<8x256xf32>
    %121 = arith.negf %120 : vector<8x256xf32>
    %122 = math.exp %121 : vector<8x256xf32>
    %cst_36 = arith.constant 1.000000e+00 : f32
    %123 = vector.broadcast %cst_36 : f32 to vector<8x256xf32>
    %124 = arith.addf %123, %122 : vector<8x256xf32>
    %125 = arith.divf %123, %124 : vector<8x256xf32>
    %126 = vector.extract_strided_slice %125 {offsets = [0, 0], sizes = [8, 128], strides = [1, 1]} : vector<8x256xf32> to vector<8x128xf32>
    %127 = vector.extract_strided_slice %125 {offsets = [0, 128], sizes = [8, 128], strides = [1, 1]} : vector<8x256xf32> to vector<8x128xf32>
    %128 = vector.extract_strided_slice %113 {offsets = [0, 256], sizes = [8, 128], strides = [1, 1]} : vector<8x384xf32> to vector<8x128xf32>
    %129 = vector.extract_strided_slice %117 {offsets = [0, 256], sizes = [8, 128], strides = [1, 1]} : vector<8x384xf32> to vector<8x128xf32>
    %130 = arith.mulf %126, %129 : vector<8x128xf32>
    %131 = arith.addf %128, %130 : vector<8x128xf32>
    %132 = math.tanh %131 : vector<8x128xf32>
    %cst_37 = arith.constant 1.000000e+00 : f32
    %133 = vector.broadcast %cst_37 : f32 to vector<8x128xf32>
    %134 = arith.subf %133, %127 : vector<8x128xf32>
    %135 = arith.mulf %134, %132 : vector<8x128xf32>
    %136 = arith.mulf %127, %104 : vector<8x128xf32>
    %137 = arith.addf %135, %136 : vector<8x128xf32>
    %138 = arith.truncf %137 : vector<8x128xf32> to vector<8x128xbf16>
    %c0_38 = arith.constant 0 : index
    %139 = arith.index_cast %111 : i32 to index
    %c0_39 = arith.constant 0 : index
    %140 = vector.load %arg6[%c0_38, %139, %c0_39] : memref<1x72x128xbf16, #tpu.memory_space<vmem>>, vector<1x8x128xbf16>
    %141 = vector.shape_cast %140 : vector<1x8x128xbf16> to vector<8x128xbf16>
    %142 = vector.shape_cast %138 : vector<8x128xbf16> to vector<1x8x128xbf16>
    tpu.vector_store %arg6[%c0_38, %139, %c0_39], %142 {strides = array<i32>} : memref<1x72x128xbf16, #tpu.memory_space<vmem>>, vector<1x8x128xbf16>,
    %c4_i32 = arith.constant 4 : i32
    %c8_i32_40 = arith.constant 8 : i32
    %143 = arith.muli %c4_i32, %c8_i32_40 : i32
    %144 = tpu.assume_multiple %143, 8 : i32
    %145 = arith.index_cast %144 : i32 to index
    %c0_41 = arith.constant 0 : index
    %146 = vector.load %arg7[%145, %c0_41] : memref<72x384xf32, #tpu.memory_space<vmem>>, vector<8x384xf32>
    %147 = arith.truncf %137 : vector<8x128xf32> to vector<8x128xbf16>
    %cst_42 = arith.constant dense<0.000000e+00> : vector<8x384xf32>
    %148 = tpu.matmul %147, %8, %cst_42 {dimension_numbers = #tpu.dot_dimension_numbers<[1], [0], [0], [1], [0, 0, 1, 1], [], []>} : vector<8x128xbf16>, vector<128x384xbf16>, vector<8x384xf32> -> vector<8x384xf32>
    %149 = vector.broadcast %9 : vector<1x384xf32> to vector<8x384xf32>
    %150 = arith.addf %148, %149 : vector<8x384xf32>
    %151 = vector.extract_strided_slice %146 {offsets = [0, 0], sizes = [8, 256], strides = [1, 1]} : vector<8x384xf32> to vector<8x256xf32>
    %152 = vector.extract_strided_slice %150 {offsets = [0, 0], sizes = [8, 256], strides = [1, 1]} : vector<8x384xf32> to vector<8x256xf32>
    %153 = arith.addf %151, %152 : vector<8x256xf32>
    %154 = arith.negf %153 : vector<8x256xf32>
    %155 = math.exp %154 : vector<8x256xf32>
    %cst_43 = arith.constant 1.000000e+00 : f32
    %156 = vector.broadcast %cst_43 : f32 to vector<8x256xf32>
    %157 = arith.addf %156, %155 : vector<8x256xf32>
    %158 = arith.divf %156, %157 : vector<8x256xf32>
    %159 = vector.extract_strided_slice %158 {offsets = [0, 0], sizes = [8, 128], strides = [1, 1]} : vector<8x256xf32> to vector<8x128xf32>
    %160 = vector.extract_strided_slice %158 {offsets = [0, 128], sizes = [8, 128], strides = [1, 1]} : vector<8x256xf32> to vector<8x128xf32>
    %161 = vector.extract_strided_slice %146 {offsets = [0, 256], sizes = [8, 128], strides = [1, 1]} : vector<8x384xf32> to vector<8x128xf32>
    %162 = vector.extract_strided_slice %150 {offsets = [0, 256], sizes = [8, 128], strides = [1, 1]} : vector<8x384xf32> to vector<8x128xf32>
    %163 = arith.mulf %159, %162 : vector<8x128xf32>
    %164 = arith.addf %161, %163 : vector<8x128xf32>
    %165 = math.tanh %164 : vector<8x128xf32>
    %cst_44 = arith.constant 1.000000e+00 : f32
    %166 = vector.broadcast %cst_44 : f32 to vector<8x128xf32>
    %167 = arith.subf %166, %160 : vector<8x128xf32>
    %168 = arith.mulf %167, %165 : vector<8x128xf32>
    %169 = arith.mulf %160, %137 : vector<8x128xf32>
    %170 = arith.addf %168, %169 : vector<8x128xf32>
    %171 = arith.truncf %170 : vector<8x128xf32> to vector<8x128xbf16>
    %c0_45 = arith.constant 0 : index
    %172 = arith.index_cast %144 : i32 to index
    %c0_46 = arith.constant 0 : index
    %173 = vector.load %arg6[%c0_45, %172, %c0_46] : memref<1x72x128xbf16, #tpu.memory_space<vmem>>, vector<1x8x128xbf16>
    %174 = vector.shape_cast %173 : vector<1x8x128xbf16> to vector<8x128xbf16>
    %175 = vector.shape_cast %171 : vector<8x128xbf16> to vector<1x8x128xbf16>
    tpu.vector_store %arg6[%c0_45, %172, %c0_46], %175 {strides = array<i32>} : memref<1x72x128xbf16, #tpu.memory_space<vmem>>, vector<1x8x128xbf16>,
    %c5_i32 = arith.constant 5 : i32
    %c8_i32_47 = arith.constant 8 : i32
    %176 = arith.muli %c5_i32, %c8_i32_47 : i32
    %177 = tpu.assume_multiple %176, 8 : i32
    %178 = arith.index_cast %177 : i32 to index
    %c0_48 = arith.constant 0 : index
    %179 = vector.load %arg7[%178, %c0_48] : memref<72x384xf32, #tpu.memory_space<vmem>>, vector<8x384xf32>
    %180 = arith.truncf %170 : vector<8x128xf32> to vector<8x128xbf16>
    %cst_49 = arith.constant dense<0.000000e+00> : vector<8x384xf32>
    %181 = tpu.matmul %180, %8, %cst_49 {dimension_numbers = #tpu.dot_dimension_numbers<[1], [0], [0], [1], [0, 0, 1, 1], [], []>} : vector<8x128xbf16>, vector<128x384xbf16>, vector<8x384xf32> -> vector<8x384xf32>
    %182 = vector.broadcast %9 : vector<1x384xf32> to vector<8x384xf32>
    %183 = arith.addf %181, %182 : vector<8x384xf32>
    %184 = vector.extract_strided_slice %179 {offsets = [0, 0], sizes = [8, 256], strides = [1, 1]} : vector<8x384xf32> to vector<8x256xf32>
    %185 = vector.extract_strided_slice %183 {offsets = [0, 0], sizes = [8, 256], strides = [1, 1]} : vector<8x384xf32> to vector<8x256xf32>
    %186 = arith.addf %184, %185 : vector<8x256xf32>
    %187 = arith.negf %186 : vector<8x256xf32>
    %188 = math.exp %187 : vector<8x256xf32>
    %cst_50 = arith.constant 1.000000e+00 : f32
    %189 = vector.broadcast %cst_50 : f32 to vector<8x256xf32>
    %190 = arith.addf %189, %188 : vector<8x256xf32>
    %191 = arith.divf %189, %190 : vector<8x256xf32>
    %192 = vector.extract_strided_slice %191 {offsets = [0, 0], sizes = [8, 128], strides = [1, 1]} : vector<8x256xf32> to vector<8x128xf32>
    %193 = vector.extract_strided_slice %191 {offsets = [0, 128], sizes = [8, 128], strides = [1, 1]} : vector<8x256xf32> to vector<8x128xf32>
    %194 = vector.extract_strided_slice %179 {offsets = [0, 256], sizes = [8, 128], strides = [1, 1]} : vector<8x384xf32> to vector<8x128xf32>
    %195 = vector.extract_strided_slice %183 {offsets = [0, 256], sizes = [8, 128], strides = [1, 1]} : vector<8x384xf32> to vector<8x128xf32>
    %196 = arith.mulf %192, %195 : vector<8x128xf32>
    %197 = arith.addf %194, %196 : vector<8x128xf32>
    %198 = math.tanh %197 : vector<8x128xf32>
    %cst_51 = arith.constant 1.000000e+00 : f32
    %199 = vector.broadcast %cst_51 : f32 to vector<8x128xf32>
    %200 = arith.subf %199, %193 : vector<8x128xf32>
    %201 = arith.mulf %200, %198 : vector<8x128xf32>
    %202 = arith.mulf %193, %170 : vector<8x128xf32>
    %203 = arith.addf %201, %202 : vector<8x128xf32>
    %204 = arith.truncf %203 : vector<8x128xf32> to vector<8x128xbf16>
    %c0_52 = arith.constant 0 : index
    %205 = arith.index_cast %177 : i32 to index
    %c0_53 = arith.constant 0 : index
    %206 = vector.load %arg6[%c0_52, %205, %c0_53] : memref<1x72x128xbf16, #tpu.memory_space<vmem>>, vector<1x8x128xbf16>
    %207 = vector.shape_cast %206 : vector<1x8x128xbf16> to vector<8x128xbf16>
    %208 = vector.shape_cast %204 : vector<8x128xbf16> to vector<1x8x128xbf16>
    tpu.vector_store %arg6[%c0_52, %205, %c0_53], %208 {strides = array<i32>} : memref<1x72x128xbf16, #tpu.memory_space<vmem>>, vector<1x8x128xbf16>,
    %c6_i32 = arith.constant 6 : i32
    %c8_i32_54 = arith.constant 8 : i32
    %209 = arith.muli %c6_i32, %c8_i32_54 : i32
    %210 = tpu.assume_multiple %209, 8 : i32
    %211 = arith.index_cast %210 : i32 to index
    %c0_55 = arith.constant 0 : index
    %212 = vector.load %arg7[%211, %c0_55] : memref<72x384xf32, #tpu.memory_space<vmem>>, vector<8x384xf32>
    %213 = arith.truncf %203 : vector<8x128xf32> to vector<8x128xbf16>
    %cst_56 = arith.constant dense<0.000000e+00> : vector<8x384xf32>
    %214 = tpu.matmul %213, %8, %cst_56 {dimension_numbers = #tpu.dot_dimension_numbers<[1], [0], [0], [1], [0, 0, 1, 1], [], []>} : vector<8x128xbf16>, vector<128x384xbf16>, vector<8x384xf32> -> vector<8x384xf32>
    %215 = vector.broadcast %9 : vector<1x384xf32> to vector<8x384xf32>
    %216 = arith.addf %214, %215 : vector<8x384xf32>
    %217 = vector.extract_strided_slice %212 {offsets = [0, 0], sizes = [8, 256], strides = [1, 1]} : vector<8x384xf32> to vector<8x256xf32>
    %218 = vector.extract_strided_slice %216 {offsets = [0, 0], sizes = [8, 256], strides = [1, 1]} : vector<8x384xf32> to vector<8x256xf32>
    %219 = arith.addf %217, %218 : vector<8x256xf32>
    %220 = arith.negf %219 : vector<8x256xf32>
    %221 = math.exp %220 : vector<8x256xf32>
    %cst_57 = arith.constant 1.000000e+00 : f32
    %222 = vector.broadcast %cst_57 : f32 to vector<8x256xf32>
    %223 = arith.addf %222, %221 : vector<8x256xf32>
    %224 = arith.divf %222, %223 : vector<8x256xf32>
    %225 = vector.extract_strided_slice %224 {offsets = [0, 0], sizes = [8, 128], strides = [1, 1]} : vector<8x256xf32> to vector<8x128xf32>
    %226 = vector.extract_strided_slice %224 {offsets = [0, 128], sizes = [8, 128], strides = [1, 1]} : vector<8x256xf32> to vector<8x128xf32>
    %227 = vector.extract_strided_slice %212 {offsets = [0, 256], sizes = [8, 128], strides = [1, 1]} : vector<8x384xf32> to vector<8x128xf32>
    %228 = vector.extract_strided_slice %216 {offsets = [0, 256], sizes = [8, 128], strides = [1, 1]} : vector<8x384xf32> to vector<8x128xf32>
    %229 = arith.mulf %225, %228 : vector<8x128xf32>
    %230 = arith.addf %227, %229 : vector<8x128xf32>
    %231 = math.tanh %230 : vector<8x128xf32>
    %cst_58 = arith.constant 1.000000e+00 : f32
    %232 = vector.broadcast %cst_58 : f32 to vector<8x128xf32>
    %233 = arith.subf %232, %226 : vector<8x128xf32>
    %234 = arith.mulf %233, %231 : vector<8x128xf32>
    %235 = arith.mulf %226, %203 : vector<8x128xf32>
    %236 = arith.addf %234, %235 : vector<8x128xf32>
    %237 = arith.truncf %236 : vector<8x128xf32> to vector<8x128xbf16>
    %c0_59 = arith.constant 0 : index
    %238 = arith.index_cast %210 : i32 to index
    %c0_60 = arith.constant 0 : index
    %239 = vector.load %arg6[%c0_59, %238, %c0_60] : memref<1x72x128xbf16, #tpu.memory_space<vmem>>, vector<1x8x128xbf16>
    %240 = vector.shape_cast %239 : vector<1x8x128xbf16> to vector<8x128xbf16>
    %241 = vector.shape_cast %237 : vector<8x128xbf16> to vector<1x8x128xbf16>
    tpu.vector_store %arg6[%c0_59, %238, %c0_60], %241 {strides = array<i32>} : memref<1x72x128xbf16, #tpu.memory_space<vmem>>, vector<1x8x128xbf16>,
    %c7_i32 = arith.constant 7 : i32
    %c8_i32_61 = arith.constant 8 : i32
    %242 = arith.muli %c7_i32, %c8_i32_61 : i32
    %243 = tpu.assume_multiple %242, 8 : i32
    %244 = arith.index_cast %243 : i32 to index
    %c0_62 = arith.constant 0 : index
    %245 = vector.load %arg7[%244, %c0_62] : memref<72x384xf32, #tpu.memory_space<vmem>>, vector<8x384xf32>
    %246 = arith.truncf %236 : vector<8x128xf32> to vector<8x128xbf16>
    %cst_63 = arith.constant dense<0.000000e+00> : vector<8x384xf32>
    %247 = tpu.matmul %246, %8, %cst_63 {dimension_numbers = #tpu.dot_dimension_numbers<[1], [0], [0], [1], [0, 0, 1, 1], [], []>} : vector<8x128xbf16>, vector<128x384xbf16>, vector<8x384xf32> -> vector<8x384xf32>
    %248 = vector.broadcast %9 : vector<1x384xf32> to vector<8x384xf32>
    %249 = arith.addf %247, %248 : vector<8x384xf32>
    %250 = vector.extract_strided_slice %245 {offsets = [0, 0], sizes = [8, 256], strides = [1, 1]} : vector<8x384xf32> to vector<8x256xf32>
    %251 = vector.extract_strided_slice %249 {offsets = [0, 0], sizes = [8, 256], strides = [1, 1]} : vector<8x384xf32> to vector<8x256xf32>
    %252 = arith.addf %250, %251 : vector<8x256xf32>
    %253 = arith.negf %252 : vector<8x256xf32>
    %254 = math.exp %253 : vector<8x256xf32>
    %cst_64 = arith.constant 1.000000e+00 : f32
    %255 = vector.broadcast %cst_64 : f32 to vector<8x256xf32>
    %256 = arith.addf %255, %254 : vector<8x256xf32>
    %257 = arith.divf %255, %256 : vector<8x256xf32>
    %258 = vector.extract_strided_slice %257 {offsets = [0, 0], sizes = [8, 128], strides = [1, 1]} : vector<8x256xf32> to vector<8x128xf32>
    %259 = vector.extract_strided_slice %257 {offsets = [0, 128], sizes = [8, 128], strides = [1, 1]} : vector<8x256xf32> to vector<8x128xf32>
    %260 = vector.extract_strided_slice %245 {offsets = [0, 256], sizes = [8, 128], strides = [1, 1]} : vector<8x384xf32> to vector<8x128xf32>
    %261 = vector.extract_strided_slice %249 {offsets = [0, 256], sizes = [8, 128], strides = [1, 1]} : vector<8x384xf32> to vector<8x128xf32>
    %262 = arith.mulf %258, %261 : vector<8x128xf32>
    %263 = arith.addf %260, %262 : vector<8x128xf32>
    %264 = math.tanh %263 : vector<8x128xf32>
    %cst_65 = arith.constant 1.000000e+00 : f32
    %265 = vector.broadcast %cst_65 : f32 to vector<8x128xf32>
    %266 = arith.subf %265, %259 : vector<8x128xf32>
    %267 = arith.mulf %266, %264 : vector<8x128xf32>
    %268 = arith.mulf %259, %236 : vector<8x128xf32>
    %269 = arith.addf %267, %268 : vector<8x128xf32>
    %270 = arith.truncf %269 : vector<8x128xf32> to vector<8x128xbf16>
    %c0_66 = arith.constant 0 : index
    %271 = arith.index_cast %243 : i32 to index
    %c0_67 = arith.constant 0 : index
    %272 = vector.load %arg6[%c0_66, %271, %c0_67] : memref<1x72x128xbf16, #tpu.memory_space<vmem>>, vector<1x8x128xbf16>
    %273 = vector.shape_cast %272 : vector<1x8x128xbf16> to vector<8x128xbf16>
    %274 = vector.shape_cast %270 : vector<8x128xbf16> to vector<1x8x128xbf16>
    tpu.vector_store %arg6[%c0_66, %271, %c0_67], %274 {strides = array<i32>} : memref<1x72x128xbf16, #tpu.memory_space<vmem>>, vector<1x8x128xbf16>,
    %c8_i32_68 = arith.constant 8 : i32
    %c8_i32_69 = arith.constant 8 : i32
    %275 = arith.muli %c8_i32_68, %c8_i32_69 : i32
    %276 = tpu.assume_multiple %275, 8 : i32
    %277 = arith.index_cast %276 : i32 to index
    %c0_70 = arith.constant 0 : index
    %278 = vector.load %arg7[%277, %c0_70] : memref<72x384xf32, #tpu.memory_space<vmem>>, vector<8x384xf32>
    %279 = arith.truncf %269 : vector<8x128xf32> to vector<8x128xbf16>
    %cst_71 = arith.constant dense<0.000000e+00> : vector<8x384xf32>
    %280 = tpu.matmul %279, %8, %cst_71 {dimension_numbers = #tpu.dot_dimension_numbers<[1], [0], [0], [1], [0, 0, 1, 1], [], []>} : vector<8x128xbf16>, vector<128x384xbf16>, vector<8x384xf32> -> vector<8x384xf32>
    %281 = vector.broadcast %9 : vector<1x384xf32> to vector<8x384xf32>
    %282 = arith.addf %280, %281 : vector<8x384xf32>
    %283 = vector.extract_strided_slice %278 {offsets = [0, 0], sizes = [8, 256], strides = [1, 1]} : vector<8x384xf32> to vector<8x256xf32>
    %284 = vector.extract_strided_slice %282 {offsets = [0, 0], sizes = [8, 256], strides = [1, 1]} : vector<8x384xf32> to vector<8x256xf32>
    %285 = arith.addf %283, %284 : vector<8x256xf32>
    %286 = arith.negf %285 : vector<8x256xf32>
    %287 = math.exp %286 : vector<8x256xf32>
    %cst_72 = arith.constant 1.000000e+00 : f32
    %288 = vector.broadcast %cst_72 : f32 to vector<8x256xf32>
    %289 = arith.addf %288, %287 : vector<8x256xf32>
    %290 = arith.divf %288, %289 : vector<8x256xf32>
    %291 = vector.extract_strided_slice %290 {offsets = [0, 0], sizes = [8, 128], strides = [1, 1]} : vector<8x256xf32> to vector<8x128xf32>
    %292 = vector.extract_strided_slice %290 {offsets = [0, 128], sizes = [8, 128], strides = [1, 1]} : vector<8x256xf32> to vector<8x128xf32>
    %293 = vector.extract_strided_slice %278 {offsets = [0, 256], sizes = [8, 128], strides = [1, 1]} : vector<8x384xf32> to vector<8x128xf32>
    %294 = vector.extract_strided_slice %282 {offsets = [0, 256], sizes = [8, 128], strides = [1, 1]} : vector<8x384xf32> to vector<8x128xf32>
    %295 = arith.mulf %291, %294 : vector<8x128xf32>
    %296 = arith.addf %293, %295 : vector<8x128xf32>
    %297 = math.tanh %296 : vector<8x128xf32>
    %cst_73 = arith.constant 1.000000e+00 : f32
    %298 = vector.broadcast %cst_73 : f32 to vector<8x128xf32>
    %299 = arith.subf %298, %292 : vector<8x128xf32>
    %300 = arith.mulf %299, %297 : vector<8x128xf32>
    %301 = arith.mulf %292, %269 : vector<8x128xf32>
    %302 = arith.addf %300, %301 : vector<8x128xf32>
    %303 = arith.truncf %302 : vector<8x128xf32> to vector<8x128xbf16>
    %c0_74 = arith.constant 0 : index
    %304 = arith.index_cast %276 : i32 to index
    %c0_75 = arith.constant 0 : index
    %305 = vector.load %arg6[%c0_74, %304, %c0_75] : memref<1x72x128xbf16, #tpu.memory_space<vmem>>, vector<1x8x128xbf16>
    %306 = vector.shape_cast %305 : vector<1x8x128xbf16> to vector<8x128xbf16>
    %307 = vector.shape_cast %303 : vector<8x128xbf16> to vector<1x8x128xbf16>
    tpu.vector_store %arg6[%c0_74, %304, %c0_75], %307 {strides = array<i32>} : memref<1x72x128xbf16, #tpu.memory_space<vmem>>, vector<1x8x128xbf16>,
    %c9_i32 = arith.constant 9 : i32
    return
  }
  func.func @transform_0(%arg0: i32) -> (i32, i32, i32) {
    %c0_i32 = arith.constant 0 : i32
    %c0_i32_0 = arith.constant 0 : i32
    %c0_i32_1 = arith.constant 0 : i32
    return %arg0, %c0_i32, %c0_i32_0 : i32, i32, i32
  }
  func.func @transform_1(%arg0: i32) -> (i32, i32) {
    %c0_i32 = arith.constant 0 : i32
    %c0_i32_0 = arith.constant 0 : i32
    %c0_i32_1 = arith.constant 0 : i32
    return %c0_i32, %c0_i32_0 : i32, i32
  }
  func.func @transform_2(%arg0: i32) -> (i32, i32) {
    %c0_i32 = arith.constant 0 : i32
    %c0_i32_0 = arith.constant 0 : i32
    %c0_i32_1 = arith.constant 0 : i32
    return %c0_i32, %c0_i32_0 : i32, i32
  }
  func.func @transform_3(%arg0: i32) -> (i32, i32) {
    %c0_i32 = arith.constant 0 : i32
    %c0_i32_0 = arith.constant 0 : i32
    %c0_i32_1 = arith.constant 0 : i32
    return %c0_i32, %c0_i32_0 : i32, i32
  }
  func.func @transform_4(%arg0: i32) -> (i32, i32) {
    %c0_i32 = arith.constant 0 : i32
    %c0_i32_0 = arith.constant 0 : i32
    %c0_i32_1 = arith.constant 0 : i32
    return %c0_i32, %c0_i32_0 : i32, i32
  }
  func.func @transform_5(%arg0: i32) -> (i32, i32, i32) {
    %c0_i32 = arith.constant 0 : i32
    %c0_i32_0 = arith.constant 0 : i32
    %c0_i32_1 = arith.constant 0 : i32
    return %arg0, %c0_i32, %c0_i32_0 : i32, i32, i32
  }
}

</mosaic_0001>

<bundles_post_ra>
// kernel: tpu_custom_call.1
= control target key start
LH: loop header
LB: loop body
LE: loop exit
PB: predicated region body
PF: predicated region fallthrough
CT: control target
= control target key end

     0   :  { %10 = vsyncpa [#allocation4], 0  ;;  %s3057_s0 = inlined_call_operand.hbm [shape: bf16[1,72,128], index: 0, kind: input, shape index: {}]   ;;  %s3058_s1 = inlined_call_operand.hbm [shape: bf16[128,384], index: 1, kind: input, shape index: {}]   ;;  %s3059_s2 = inlined_call_operand.hbm [shape: bf16[128,384], index: 2, kind: input, shape index: {}]   ;;  %s3060_s3 = inlined_call_operand.vmem [shape: f32[1,384], index: 3, kind: input, shape index: {}]   ;;  %s3061_s4 = inlined_call_operand.vmem [shape: f32[1,384], index: 4, kind: input, shape index: {}]   ;;  %s3062_s5 = inlined_call_operand.hbm [shape: bf16[1,72,128], index: 5, kind: output, shape index: {}]  }
   0x1   :  { %11 = vsyncpa [#allocation7], 0 }
   0x2   :  { %12 = vsyncpa [#allocation5], 0  ;;  %s2335_s18 = smov [#allocation6]   ;;  %s2241_s22 = scalar_lea.hbm %s3058_s1, 3072 }
   0x3   :  { %s30_s19 = sshll.u32 %s2335_s18, 4  ;;  %p2242_p0 = scmp.ne.s32.totalorder %s3058_s1, %s2241_s22  ;;  %s31_s19 = int_to_ptr.vmem [resolvable:$true] %s30_s19 }
   0x4   :  { %p2245_p1 = scmp.lt.u32.totalorder %s2241_s22, %s3058_s1 }
   0x6   :  { %p2247_p2 = pnand %p2245_p1, %p2242_p0 }
   0x8   :  { %2250 = shalt.err (!%p2247_p2)
}
   0x9   :  { %s2251_s27 = scalar_lea.vmem %s31_s19, 3072  ;;  %p2256_p4 = scmp.lt.s32.totalorder %s31_s19, %s31_s19 }
   0xa   :  { %p2252_p3 = scmp.ne.s32.totalorder %s31_s19, %s2251_s27  ;;  %p2257_p5 = scmp.lt.s32.totalorder %s2251_s27, %s2251_s27 }
   0xc   :  { %p2258_p6 = por %p2257_p5, %p2256_p4 }
   0xe   :  { %p2259_p7 = pnand %p2258_p6, %p2252_p3 }
  0x10   :  { %2262 = shalt.err (!%p2259_p7)
}
  0x11   :  { %s2336_s28 = smov 192   ;;  %s2337_s29 = smov 12  }
  0x12   :  { %36 = dma.hbm_to_vmem [thread:$0]  %s3058_s1, 3072, %s31_s19, [#allocation7], %s2336_s28, %s2336_s28, %s2337_s29  }
  0x13   :  { %s2338_s7 = smov [#allocation3]   ;;  %s2263_s11 = scalar_lea.hbm %s3057_s0, 576 }
  0x14   :  { %s18_s8 = sshll.u32 %s2338_s7, 4  ;;  %p2264_p8 = scmp.ne.s32.totalorder %s3057_s0, %s2263_s11  ;;  %s19_s8 = int_to_ptr.vmem [resolvable:$true] %s18_s8 }
  0x15   :  { %p2267_p9 = scmp.lt.u32.totalorder %s2263_s11, %s3057_s0 }
  0x17   :  { %p2269_p10 = pnand %p2267_p9, %p2264_p8 }
  0x19   :  { %2272 = shalt.err (!%p2269_p10)
}
  0x1a   :  { %s2273_s16 = scalar_lea.vmem %s19_s8, 576  ;;  %p2278_p12 = scmp.lt.s32.totalorder %s19_s8, %s19_s8 }
  0x1b   :  { %p2274_p11 = scmp.ne.s32.totalorder %s19_s8, %s2273_s16  ;;  %p2279_p13 = scmp.lt.s32.totalorder %s2273_s16, %s2273_s16 }
  0x1d   :  { %p2280_p0 = por %p2279_p13, %p2278_p12 }
  0x1f   :  { %p2281_p1 = pnand %p2280_p0, %p2274_p11 }
  0x21   :  { %2284 = shalt.err (!%p2281_p1)
}
  0x22   :  { %s2339_s1 = smov 64   ;;  %s2340_s17 = smov 4  }
  0x23   :  { %24 = dma.hbm_to_vmem [thread:$0]  %s3057_s0, 576, %s19_s8, [#allocation4], %s2339_s1, %s2339_s1, %s2340_s17  }
  0x24   :  { %s2341_s20 = smov [#allocation8]   ;;  %s2285_s24 = scalar_lea.hbm %s3059_s2, 3072 }
  0x25   :  { %s42_s21 = sshll.u32 %s2341_s20, 4  ;;  %p2286_p2 = scmp.ne.s32.totalorder %s3059_s2, %s2285_s24  ;;  %s43_s21 = int_to_ptr.vmem [resolvable:$true] %s42_s21 }
  0x26   :  { %p2289_p3 = scmp.lt.u32.totalorder %s2285_s24, %s3059_s2 }
  0x28   :  { %p2291_p4 = pnand %p2289_p3, %p2286_p2 }
  0x2a   :  { %2294 = shalt.err (!%p2291_p4)
}
  0x2b   :  { %s2295_s6 = scalar_lea.vmem %s43_s21, 3072  ;;  %p2300_p6 = scmp.lt.s32.totalorder %s43_s21, %s43_s21 }
  0x2c   :  { %p2296_p5 = scmp.ne.s32.totalorder %s43_s21, %s2295_s6  ;;  %p2301_p7 = scmp.lt.s32.totalorder %s2295_s6, %s2295_s6 }
  0x2e   :  { %p2302_p8 = por %p2301_p7, %p2300_p6 }
  0x30   :  { %p2303_p9 = pnand %p2302_p8, %p2296_p5 }
  0x32   :  { %2306 = shalt.err (!%p2303_p9)
}
  0x33   :  { %48 = dma.hbm_to_vmem [thread:$0]  %s3059_s2, 3072, %s43_s21, [#allocation7], %s2336_s28, %s2336_s28, %s2337_s29  }
  0x34   :  { %2329 = dma.done.wait [#allocation4], 576  }
  0x35   :  { %2330 = vsyncadd [#allocation4], 4294966720 }
  0x36   :  { %2331 = dma.done.wait [#allocation7], 6144  }
  0x37   :  { %2332 = vsyncadd [#allocation7], 4294961152  ;;  %v3065_v0 = vmov 0.0   ;;  %v3063_v1 = vmov 0   ;;  %vm2344_vm0 = vmmov 0   ;;  %v2084_v25 = vld [vmem:[#allocation3] sm:$0xff]   ;;  %v106_v55 = vlaneseq }
  0x38   :  { %1823 = vmatprep.subr.bf16.mxu1 %v3065_v0  ;;  %309 = vmatprep.mubr.bf16.mxu0 %v3063_v1  ;;  %v2058_v2 = vld [vmem:[#allocation6 + $0x4] ss:$12 sps:$4 sm:$0xff]   ;;  %v2060_v3 = vld [vmem:[#allocation6] ss:$12 sps:$4 sm:$0xff]   ;;  %v2061_v4 = vld [vmem:[#allocation6 + $0x1c] ss:$12 sps:$4 sm:$0xff]  }
  0x39   :  { %1839 = vmatprep.mubr.msk.bf16.mxu1 %vm2344_vm0, %v3065_v0  ;;  %277 = vmatprep.subr.bf16.mxu0 %v2058_v2  ;;  %v2063_v5 = vld [vmem:[#allocation6 + $0x18] ss:$12 sps:$4 sm:$0xff]   ;;  %v2064_v6 = vld [vmem:[#allocation6 + $0x34] ss:$12 sps:$4 sm:$0xff]   ;;  %v2066_v7 = vld [vmem:[#allocation6 + $0x30] ss:$12 sps:$4 sm:$0xff]  }
  0x3a   :  { %278 = vmatpush1.bf16.msra.mxu0 %v2060_v3  ;;  %v2067_v8 = vld [vmem:[#allocation6 + $0x4c] ss:$12 sps:$4 sm:$0xff]   ;;  %v2079_v9 = vld [vmem:[#allocation6 + $0x8] ss:$12 sps:$4 sm:$0xff]   ;;  %v2070_v11 = vld [vmem:[#allocation6 + $0x64] ss:$12 sps:$4 sm:$0xff]  }
  0x3b   :  { %279 = vmatprep.subr.bf16.mxu0 %v2061_v4  ;;  %v2069_v10 = vld [vmem:[#allocation6 + $0x48] ss:$12 sps:$4 sm:$0xff]   ;;  %1824 = vmatpush3.bf16.msra.mxu1 %v2079_v9  ;;  %v2083_v12 = vld [vmem:[#allocation6 + $0x20] ss:$12 sps:$4 sm:$0xff]   ;;  %v2088_v15 = vld [vmem:[#allocation6 + $0x38] ss:$12 sps:$4 sm:$0xff]  }
  0x3c   :  { %1825 = vmatprep.subr.bf16.mxu1 %v3065_v0  ;;  %v2072_v13 = vld [vmem:[#allocation6 + $0x60] ss:$12 sps:$4 sm:$0xff]   ;;  %v2073_v14 = vld [vmem:[#allocation6 + $0x7c] ss:$12 sps:$4 sm:$0xff]   ;;  %v2075_v16 = vld [vmem:[#allocation6 + $0x78] ss:$12 sps:$4 sm:$0xff]  }
  0x3d   :  { %v2076_v17 = vld [vmem:[#allocation6 + $0x94] ss:$12 sps:$4 sm:$0xff]   ;;  %v2092_v18 = vld [vmem:[#allocation6 + $0x50] ss:$12 sps:$4 sm:$0xff]   ;;  %v2080_v20 = vld [vmem:[#allocation6 + $0xac] ss:$12 sps:$4 sm:$0xff]  }
  0x3e   :  { %280 = vmatpush1.bf16.msra.mxu0 %v2063_v5  ;;  %v2078_v19 = vld [vmem:[#allocation6 + $0x90] ss:$12 sps:$4 sm:$0xff]   ;;  %v2096_v21 = vld [vmem:[#allocation6 + $0x68] ss:$12 sps:$4 sm:$0xff]   ;;  %v2098_v24 = vld [vmem:[#allocation6 + $0x80] ss:$12 sps:$4 sm:$0xff]  }
  0x3f   :  { %281 = vmatprep.subr.bf16.mxu0 %v2064_v6  ;;  %1826 = vmatpush3.bf16.msra.mxu1 %v2083_v12  ;;  %v2082_v22 = vld [vmem:[#allocation6 + $0xa8] ss:$12 sps:$4 sm:$0xff]   ;;  %v2429_v23 = vld [vmem:[#allocation8 + $0x4] ss:$12 sps:$4 sm:$0xff]   ;;  %v2432_v26 = vld [vmem:[#allocation8] ss:$12 sps:$4 sm:$0xff]  }
  0x40   :  { %1827 = vmatprep.subr.bf16.mxu1 %v3065_v0  ;;  %v2435_v27 = vld [vmem:[#allocation8 + $0x1c] ss:$12 sps:$4 sm:$0xff]   ;;  %v2103_v28 = vld [vmem:[#allocation6 + $0x98] ss:$12 sps:$4 sm:$0xff]   ;;  %v2442_v30 = vld [vmem:[#allocation8 + $0x34] ss:$12 sps:$4 sm:$0xff]  }
  0x41   :  { %v2439_v29 = vld [vmem:[#allocation8 + $0x18] ss:$12 sps:$4 sm:$0xff]   ;;  %v2107_v31 = vld [vmem:[#allocation6 + $0xb0] ss:$12 sps:$4 sm:$0xff]   ;;  %v2453_v35 = vld [vmem:[#allocation8 + $0x8] ss:$12 sps:$4 sm:$0xff]  }
  0x42   :  { %282 = vmatpush1.bf16.msra.mxu0 %v2066_v7  ;;  %v2093_v32 = vld [vmem:[#allocation3 + $0x8] sm:$0xff]   ;;  %v2447_v33 = vld [vmem:[#allocation8 + $0x30] ss:$12 sps:$4 sm:$0xff]   ;;  %v2450_v34 = vld [vmem:[#allocation8 + $0x4c] ss:$12 sps:$4 sm:$0xff]   ;;  %v2568_v59 = vshrl.u32 %v106_v55, 7 }
  0x43   :  { %283 = vmatprep.subr.bf16.mxu0 %v2067_v8  ;;  %1828 = vmatpush3.bf16.msra.mxu1 %v2088_v15  ;;  %v2457_v36 = vld [vmem:[#allocation8 + $0x48] ss:$12 sps:$4 sm:$0xff]   ;;  %v2460_v37 = vld [vmem:[#allocation8 + $0x64] ss:$12 sps:$4 sm:$0xff]   ;;  %v2465_v38 = vld [vmem:[#allocation8 + $0x20] ss:$12 sps:$4 sm:$0xff]  }
  0x44   :  { %1829 = vmatprep.subr.bf16.mxu1 %v3065_v0  ;;  %v2101_v39 = vld [vmem:[#allocation3 + $0x10] sm:$0xff]   ;;  %v2472_v41 = vld [vmem:[#allocation8 + $0x7c] ss:$12 sps:$4 sm:$0xff]   ;;  %v2475_v42 = vld [vmem:[#allocation8 + $0x38] ss:$12 sps:$4 sm:$0xff]   ;;  %v3067_v61 = vsub.s32 2, %v2568_v59 }
  0x45   :  { %v2469_v40 = vld [vmem:[#allocation8 + $0x60] ss:$12 sps:$4 sm:$0xff]   ;;  %v2480_v43 = vld [vmem:[#allocation8 + $0x78] ss:$12 sps:$4 sm:$0xff]   ;;  %v2488_v45 = vld [vmem:[#allocation8 + $0x50] ss:$12 sps:$4 sm:$0xff]  }
  0x46   :  { %284 = vmatpush1.bf16.msra.mxu0 %v2069_v10  ;;  %v2483_v44 = vld [vmem:[#allocation8 + $0x94] ss:$12 sps:$4 sm:$0xff]   ;;  %v2492_v47 = vld [vmem:[#allocation8 + $0x90] ss:$12 sps:$4 sm:$0xff]   ;;  %v2495_v48 = vld [vmem:[#allocation8 + $0xac] ss:$12 sps:$4 sm:$0xff]  }
  0x47   :  { %285 = vmatprep.subr.bf16.mxu0 %v2070_v11  ;;  %1830 = vmatpush3.bf16.msra.mxu1 %v2092_v18  ;;  %v2108_v46 = vld [vmem:[#allocation3 + $0x18] sm:$0xff]   ;;  %v2509_v51 = vld [vmem:[#allocation8 + $0x80] ss:$12 sps:$4 sm:$0xff]   ;;  %v2116_v52 = vld [vmem:[#allocation3 + $0x20] ss:$0 sps:$4 sm:$0xff]   ;;  %v108_v55 = vsub.s32 0, %v2568_v59 }
  0x48   :  { %1831 = vmatprep.subr.bf16.mxu1 %v3065_v0  ;;  %v2498_v49 = vld [vmem:[#allocation8 + $0x68] ss:$12 sps:$4 sm:$0xff]   ;;  %v2515_v53 = vld [vmem:[#allocation8 + $0x98] ss:$12 sps:$4 sm:$0xff]   ;;  %v2522_v54 = vld [vmem:[#allocation8 + $0xb0] ss:$12 sps:$4 sm:$0xff]  }
  0x49   :  { %v2503_v50 = vld [vmem:[#allocation8 + $0xa8] ss:$12 sps:$4 sm:$0xff]   ;;  %v104_v62 = vld [vmem:[%s3060_s3] sm:$0x7] }
  0x4a   :  { %286 = vmatpush1.bf16.msra.mxu0 %v2072_v13  ;;  %v2582_v3 = vrot.slane %v104_v62, %v3067_v61 }
  0x4b   :  { %287 = vmatprep.subr.bf16.mxu0 %v2073_v14  ;;  %1832 = vmatpush3.bf16.msra.mxu1 %v2096_v21 }
  0x4c   :  { %1833 = vmatprep.subr.bf16.mxu1 %v3065_v0 }
  0x4e   :  { %288 = vmatpush1.bf16.msra.mxu0 %v2075_v16 }
  0x4f   :  { %289 = vmatprep.subr.bf16.mxu0 %v2076_v17  ;;  %1834 = vmatpush3.bf16.msra.mxu1 %v2098_v24 }
  0x50   :  { %1835 = vmatprep.subr.bf16.mxu1 %v3065_v0 }
  0x52   :  { %290 = vmatpush1.bf16.msra.mxu0 %v2078_v19 }
  0x53   :  { %291 = vmatprep.subr.bf16.mxu0 %v2080_v20  ;;  %1836 = vmatpush3.bf16.msra.mxu1 %v2103_v28 }
  0x54   :  { %1837 = vmatprep.subr.bf16.mxu1 %v3065_v0 }
  0x56   :  { %292 = vmatpush1.bf16.msra.mxu0 %v2082_v22 }
  0x57   :  { %640 = vmatprep.subr.bf16.mxu0 %v2429_v23  ;;  %1838 = vmatpush3.bf16.msra.mxu1 %v2107_v31 }
  0x58   :  { %1859 = vmatprep.subr.bf16.mxu1 %v3065_v0 }
  0x59   :  { %310 = vmatmul.mubr.bf16.vlgmr.msra.gmra.mrb[0].mxu0 %v2084_v25 }
  0x5a   :  { %641 = vmatpush1.bf16.msra.mxu0 %v2432_v26  ;;  %319 = vmatprep.mubr.bf16.mxu0 %v3063_v1 }
  0x5b   :  { %642 = vmatprep.subr.bf16.mxu0 %v2435_v27  ;;  %1840 = vmatmul.mubr.bf16.vlgmr.msra.gmra.mrb[0].mxu1 %v2084_v25 }
  0x5c   :  { %1860 = vmatpush3.bf16.msra.mxu1 %v2453_v35  ;;  %1843 = vmatprep.mubr.msk.bf16.mxu1 %vm2344_vm0, %v3065_v0 }
  0x5d   :  { %1861 = vmatprep.subr.bf16.mxu1 %v3065_v0 }
  0x5e   :  { %643 = vmatpush1.bf16.msra.mxu0 %v2439_v29 }
  0x5f   :  { %644 = vmatprep.subr.bf16.mxu0 %v2442_v30 }
  0x60   :  { %1862 = vmatpush3.bf16.msra.mxu1 %v2465_v38 }
  0x61   :  { %320 = vmatmul.mubr.bf16.gmra.mrb[4].mxu0 %v2093_v32  ;;  %1863 = vmatprep.subr.bf16.mxu1 %v3065_v0 }
  0x62   :  { %645 = vmatpush1.bf16.msra.mxu0 %v2447_v33  ;;  %329 = vmatprep.mubr.bf16.mxu0 %v3063_v1 }
  0x63   :  { %646 = vmatprep.subr.bf16.mxu0 %v2450_v34  ;;  %1844 = vmatmul.mubr.bf16.gmra.mrb[4].mxu1 %v2093_v32 }
  0x64   :  { %1864 = vmatpush3.bf16.msra.mxu1 %v2475_v42  ;;  %1847 = vmatprep.mubr.msk.bf16.mxu1 %vm2344_vm0, %v3065_v0 }
  0x65   :  { %1865 = vmatprep.subr.bf16.mxu1 %v3065_v0 }
  0x66   :  { %647 = vmatpush1.bf16.msra.mxu0 %v2457_v36 }
  0x67   :  { %648 = vmatprep.subr.bf16.mxu0 %v2460_v37 }
  0x68   :  { %1866 = vmatpush3.bf16.msra.mxu1 %v2488_v45 }
  0x69   :  { %330 = vmatmul.mubr.bf16.gmra.mrb[8].mxu0 %v2101_v39  ;;  %1867 = vmatprep.subr.bf16.mxu1 %v3065_v0 }
  0x6a   :  { %649 = vmatpush1.bf16.msra.mxu0 %v2469_v40  ;;  %339 = vmatprep.mubr.bf16.mxu0 %v3063_v1 }
  0x6b   :  { %650 = vmatprep.subr.bf16.mxu0 %v2472_v41  ;;  %1848 = vmatmul.mubr.bf16.gmra.mrb[8].mxu1 %v2101_v39 }
  0x6c   :  { %1851 = vmatprep.mubr.msk.bf16.mxu1 %vm2344_vm0, %v3065_v0  ;;  %1868 = vmatpush3.bf16.msra.mxu1 %v2498_v49 }
  0x6d   :  { %1869 = vmatprep.subr.bf16.mxu1 %v3065_v0 }
  0x6e   :  { %651 = vmatpush1.bf16.msra.mxu0 %v2480_v43 }
  0x6f   :  { %652 = vmatprep.subr.bf16.mxu0 %v2483_v44 }
  0x70   :  { %1870 = vmatpush3.bf16.msra.mxu1 %v2509_v51 }
  0x71   :  { %340 = vmatmul.mubr.bf16.gmra.mrb[12].mxu0 %v2108_v46  ;;  %1871 = vmatprep.subr.bf16.mxu1 %v3065_v0 }
  0x72   :  { %349 = vmatprep.mubr.bf16.mxu0 %v3063_v1  ;;  %653 = vmatpush1.bf16.msra.mxu0 %v2492_v47 }
  0x73   :  { %654 = vmatprep.subr.bf16.mxu0 %v2495_v48  ;;  %1852 = vmatmul.mubr.bf16.gmra.mrb[12].mxu1 %v2108_v46 }
  0x74   :  { %1855 = vmatprep.mubr.msk.bf16.mxu1 %vm2344_vm0, %v3065_v0  ;;  %1872 = vmatpush3.bf16.msra.mxu1 %v2515_v53 }
  0x75   :  { %1873 = vmatprep.subr.bf16.mxu1 %v3065_v0 }
  0x76   :  { %655 = vmatpush1.bf16.msra.mxu0 %v2503_v50 }
  0x77   :  { %750 = vmatprep.subr.bf16.mxu0 %v2429_v23 }
  0x78   :  { %1874 = vmatpush3.bf16.msra.mxu1 %v2522_v54 }
  0x79   :  { %350 = vmatmul.mubr.bf16.gmra.mrb[16].mxu0 %v2116_v52  ;;  %1879 = vmatprep.subr.bf16.mxu1 %v3065_v0 }
  0x7a   :  { %672 = vmatprep.mubr.bf16.mxu0 %v3063_v1 }
  0x7b   :  { %1856 = vmatmul.mubr.bf16.gmra.mrb[16].mxu1 %v2116_v52 }
  0x7c   :  { %1875 = vmatprep.mubr.msk.bf16.mxu1 %vm2344_vm0, %v3065_v0 }
  0x81   :  { %673 = vmatmul.mubr.bf16.vlgmr.msra.gmra.mrb[20].mxu0 %v3063_v1 }
  0x82   :  { %751 = vmatpush1.bf16.msra.mxu0 %v2432_v26  ;;  %782 = vmatprep.mubr.bf16.mxu0 %v3063_v1 }
  0x83   :  { %752 = vmatprep.subr.bf16.mxu0 %v2435_v27  ;;  %1876 = vmatmul.mubr.bf16.vlgmr.msra.gmra.mrb[20].mxu1 %v3063_v1 }
  0x84   :  { %1880 = vmatpush3.bf16.msra.mxu1 %v2453_v35  ;;  %1895 = vmatprep.mubr.msk.bf16.mxu1 %vm2344_vm0, %v3065_v0 }
  0x85   :  { %1881 = vmatprep.subr.bf16.mxu1 %v3065_v0 }
  0x86   :  { %753 = vmatpush1.bf16.msra.mxu0 %v2439_v29 }
  0x87   :  { %754 = vmatprep.subr.bf16.mxu0 %v2442_v30 }
  0x88   :  { %1882 = vmatpush3.bf16.msra.mxu1 %v2465_v38 }
  0x89   :  { %1883 = vmatprep.subr.bf16.mxu1 %v3065_v0 }
  0x8a   :  { %755 = vmatpush1.bf16.msra.mxu0 %v2447_v33 }
  0x8b   :  { %756 = vmatprep.subr.bf16.mxu0 %v2450_v34 }
  0x8c   :  { %1884 = vmatpush3.bf16.msra.mxu1 %v2475_v42 }
  0x8d   :  { %1885 = vmatprep.subr.bf16.mxu1 %v3065_v0 }
  0x8e   :  { %757 = vmatpush1.bf16.msra.mxu0 %v2457_v36 }
  0x8f   :  { %758 = vmatprep.subr.bf16.mxu0 %v2460_v37 }
  0x90   :  { %1886 = vmatpush3.bf16.msra.mxu1 %v2488_v45 }
  0x91   :  { %1887 = vmatprep.subr.bf16.mxu1 %v3065_v0 }
  0x92   :  { %759 = vmatpush1.bf16.msra.mxu0 %v2469_v40 }
  0x93   :  { %760 = vmatprep.subr.bf16.mxu0 %v2472_v41 }
  0x94   :  { %1888 = vmatpush3.bf16.msra.mxu1 %v2498_v49 }
  0x95   :  { %1889 = vmatprep.subr.bf16.mxu1 %v3065_v0 }
  0x96   :  { %761 = vmatpush1.bf16.msra.mxu0 %v2480_v43 }
  0x97   :  { %762 = vmatprep.subr.bf16.mxu0 %v2483_v44 }
  0x98   :  { %1890 = vmatpush3.bf16.msra.mxu1 %v2509_v51 }
  0x99   :  { %1891 = vmatprep.subr.bf16.mxu1 %v3065_v0 }
  0x9a   :  { %763 = vmatpush1.bf16.msra.mxu0 %v2492_v47 }
  0x9b   :  { %764 = vmatprep.subr.bf16.mxu0 %v2495_v48 }
  0x9c   :  { %1892 = vmatpush3.bf16.msra.mxu1 %v2515_v53 }
  0x9d   :  { %1893 = vmatprep.subr.bf16.mxu1 %v3065_v0 }
  0x9e   :  { %765 = vmatpush1.bf16.msra.mxu0 %v2503_v50 }
  0x9f   :  { %861 = vmatprep.subr.bf16.mxu0 %v2429_v23 }
  0xa0   :  { %1894 = vmatpush3.bf16.msra.mxu1 %v2522_v54 }
  0xa1   :  { %1899 = vmatprep.subr.bf16.mxu1 %v3065_v0 }
 0x12c   :  { %v311_v56 = vpop.f32.mrb[0].mxu0 }
 0x12d   :  { %v313_v57 = vpop.f32.mrb[1].mxu0 }
 0x12e   :  { %v2566_v58 = vpop.f32.mrb[2].mxu0  ;;  %v2586_v5 = vpop.f32.mrb[0].mxu1 }
 0x12f   :  { %v2570_v60 = vpop.f32.mrb[3].mxu0  ;;  %v1841_v7 = vpop.f32.mrb[1].mxu1 }
 0x130   :  { %v395_v8 = vpop.f32.mrb[2].mxu1  ;;  %v112_v7 = vsub.s32 1, %v2568_v59 }
 0x131   :  { %v2591_v9 = vadd.f32 %v395_v8, %v2582_v3  ;;  %v1842_v10 = vpop.f32.mrb[3].mxu1  ;;  %v489_v8 = vld [vmem:[%s3061_s4] sm:$0x7]  ;;  %s2345_s4 = smov [#allocation9]  }
 0x132   :  { %v2638_v1 = vrot.slane %v489_v8, %v112_v7  ;;  %s1637_s8 = sshll.u32 %s2345_s4, 4  ;;  %s1638_s8 = int_to_ptr.vmem [resolvable:$true] %s1637_s8 }
 0x133   :  { %s2307_s9 = scalar_lea.vmem %s1638_s8, 576  ;;  %p2312_p11 = scmp.lt.s32.totalorder %s1638_s8, %s1638_s8 }
 0x134   :  { %v2576_v63 = vpop.f32.mrb[4].mxu0  ;;  %p2308_p10 = scmp.ne.s32.totalorder %s1638_s8, %s2307_s9  ;;  %p2313_p12 = scmp.lt.s32.totalorder %s2307_s9, %s2307_s9 }
 0x135   :  { %v2578_v2 = vpop.f32.mrb[5].mxu0 }
 0x136   :  { %v2584_v4 = vpop.f32.mrb[6].mxu0  ;;  %v400_v14 = vpop.f32.mrb[4].mxu1  ;;  %p2314_p13 = por %p2313_p12, %p2312_p11 }
 0x137   :  { %v2588_v6 = vpop.f32.mrb[7].mxu0  ;;  %v2602_v16 = vadd.f32 %v400_v14, %v2582_v3  ;;  %v1845_v17 = vpop.f32.mrb[5].mxu1 }
 0x138   :  { %v403_v18 = vpop.f32.mrb[6].mxu1  ;;  %p2315_p0 = pnand %p2314_p13, %p2308_p10 }
 0x139   :  { %v2605_v19 = vadd.f32 %v403_v18, %v2582_v3  ;;  %v1846_v20 = vpop.f32.mrb[7].mxu1 }
 0x13a   :  { %v2629_v20 = vrot.slane %v104_v62, %v108_v55 }
 0x13c   :  { %v2593_v11 = vpop.f32.mrb[8].mxu0  ;;  %v312_v61 = vadd.f32 %v311_v56, %v2629_v20 }
 0x13d   :  { %v2595_v12 = vpop.f32.mrb[9].mxu0 }
 0x13e   :  { %v2597_v13 = vpop.f32.mrb[10].mxu0  ;;  %v408_v25 = vpop.f32.mrb[8].mxu1 }
 0x13f   :  { %3068 = vst [vmem:[#allocation13_spill] sm:$0xff] %v2597_v13  ;;  %v2599_v15 = vpop.f32.mrb[11].mxu0  ;;  %v2616_v31 = vadd.f32 %v408_v25, %v2582_v3  ;;  %v1849_v32 = vpop.f32.mrb[9].mxu1  ;;  %v2631_v25 = vrot.slane %v489_v8, %v108_v55 }
 0x140   :  { %3069 = vst [vmem:[#allocation14_spill] sm:$0xff] %v2599_v15  ;;  %v411_v39 = vpop.f32.mrb[10].mxu1 }
 0x141   :  { %v2619_v46 = vadd.f32 %v411_v39, %v2582_v3  ;;  %v1850_v52 = vpop.f32.mrb[11].mxu1 }
 0x142   :  { %v2636_v52 = vrot.slane %v104_v62, %v112_v7 }
 0x143   :  { %3074 = vst [vmem:[#allocation19_spill] sm:$0xff] %v2619_v46 }
 0x144   :  { %v2607_v21 = vpop.f32.mrb[12].mxu0 }
 0x145   :  { %3070 = vst [vmem:[#allocation15_spill] sm:$0xff] %v2607_v21  ;;  %v2609_v22 = vpop.f32.mrb[13].mxu0 }
 0x146   :  { %3071 = vst [vmem:[#allocation16_spill] sm:$0xff] %v2609_v22  ;;  %v2611_v24 = vpop.f32.mrb[14].mxu0  ;;  %v416_v10 = vpop.f32.mrb[12].mxu1 }
 0x147   :  { %3072 = vst [vmem:[#allocation17_spill] sm:$0xff] %v2611_v24  ;;  %v2613_v28 = vpop.f32.mrb[15].mxu0  ;;  %v2627_v14 = vadd.f32 %v416_v10, %v2582_v3  ;;  %v1853_v17 = vpop.f32.mrb[13].mxu1 }
 0x148   :  { %3073 = vst [vmem:[#allocation18_spill] sm:$0xff] %v2613_v28  ;;  %v419_v18 = vpop.f32.mrb[14].mxu1  ;;  %v314_v17 = vadd.f32 %v313_v57, %v2636_v52 }
 0x149   :  { %3075 = vst [vmem:[#allocation20_spill] sm:$0xff] %v2627_v14  ;;  %v2634_v32 = vadd.f32 %v419_v18, %v2582_v3  ;;  %v1854_v39 = vpop.f32.mrb[15].mxu1 }
 0x14b   :  { %3076 = vst [vmem:[#allocation21_spill] sm:$0xff] %v2634_v32 }
 0x14e   :  { %v424_v14 = vpop.f32.mrb[16].mxu1 }
 0x14f   :  { %v2645_v39 = vadd.f32 %v424_v14, %v2582_v3  ;;  %v1857_v62 = vpop.f32.mrb[17].mxu1 }
 0x150   :  { %v427_v32 = vpop.f32.mrb[18].mxu1 }
 0x151   :  { %v1858_v46 = vpop.f32.mrb[19].mxu1 }
 0x154   :  { %v674_v0 = vpop.f32.mrb[20].mxu0 }
 0x155   :  { %v675_v10 = vadd.f32 %v674_v0, %v2631_v25  ;;  %v676_v28 = vpop.f32.mrb[21].mxu0 }
 0x156   :  { %v677_v24 = vadd.f32 %v676_v28, %v2638_v1  ;;  %v678_v55 = vpop.f32.mrb[22].mxu0  ;;  %v715_v0 = vpop.f32.mrb[20].mxu1 }
 0x157   :  { %v721_v22 = vadd.f32 %v675_v10, %v312_v61  ;;  %v679_v18 = vpop.f32.mrb[23].mxu0  ;;  %v1877_v15 = vpop.f32.mrb[21].mxu1  ;;  %v3077_v61 = vsub.s32 2, %v2568_v59 }
 0x158   :  { %v722_v7 = vadd.f32 %v677_v24, %v314_v17  ;;  %v718_v13 = vpop.f32.mrb[22].mxu1 }
 0x159   :  { %v1711_v21 = vmul.f32 -1.442695, %v721_v22  ;;  %v1878_v57 = vpop.f32.mrb[23].mxu1  ;;  %v2649_v10 = vrot.slane %v489_v8, %v3077_v61 }
 0x15a   :  { %v1712_v56 = vmul.f32 -1.442695, %v722_v7  ;;  %v316_v57 = vadd.f32 %v2566_v58, %v2629_v20 }
 0x15b   :  { %2127 = vpow2.f32 %v1711_v21  ;;  %v716_v24 = vadd.f32 %v715_v0, %v2649_v10  ;;  %v393_v21 = vadd.f32 %v2586_v5, %v2582_v3  ;;  %v3078_v3 = vmov 0.0  }
 0x15c   :  { %2129 = vpow2.f32 %v1712_v56  ;;  %v3079_v5 = vmov 0  }
 0x165   :  { %v2128_v28 = vpop.eup %2127 }
 0x166   :  { %v729_v55 = vadd.f32 1.0, %v2128_v28  ;;  %v2130_v14 = vpop.eup %2129 }
 0x167   :  { %v730_v18 = vadd.f32 1.0, %v2130_v14  ;;  %v318_v14 = vadd.f32 %v2570_v60, %v2636_v52 }
 0x168   :  { %2131 = vrcp.f32 %v729_v55 }
 0x169   :  { %2133 = vrcp.f32 %v730_v18 }
 0x172   :  { %v2132_v22 = vpop.eup %2131 }
 0x173   :  { %v735_v15 = vmul.f32 %v2132_v22, %v716_v24  ;;  %v2134_v46 = vpop.eup %2133 }
 0x174   :  { %v738_v32 = vsub.f32 1.0, %v2134_v46  ;;  %v740_v7 = vmul.f32 0.0, %v2134_v46 }
 0x175   :  { %v736_v13 = vadd.f32 %v735_v15, %v393_v21 }
 0x177   :  { %2135 = vtanh.f32 %v736_v13 }
 0x181   :  { %v2136_v17 = vpop.eup %2135 }
 0x182   :  { %v739_v62 = vmul.f32 %v2136_v17, %v738_v32 }
 0x184   :  { %v2654_v59 = vadd.f32 %v740_v7, %v739_v62 }
 0x186   :  { %v742_v8 = vpack.c.bf16 %v2654_v59, %v2654_v59 }
 0x188   :  { %743 = vst [vmem:[#allocation9] sm:$0xf] %v742_v8  ;;  %783 = vmatmul.mubr.bf16.vlgmr.msra.gmra.mrb[24].mxu0 %v742_v8  ;;  %1896 = vmatmul.mubr.bf16.vlgmr.msra.gmra.mrb[24].mxu1 %v742_v8 }
 0x189   :  { %862 = vmatpush1.bf16.msra.mxu0 %v2432_v26  ;;  %1900 = vmatpush3.bf16.msra.mxu1 %v2453_v35 }
 0x18a   :  { %863 = vmatprep.subr.bf16.mxu0 %v2435_v27  ;;  %1901 = vmatprep.subr.bf16.mxu1 %v3078_v3 }
 0x18b   :  { %893 = vmatprep.mubr.bf16.mxu0 %v3079_v5  ;;  %1915 = vmatprep.mubr.msk.bf16.mxu1 %vm2344_vm0, %v3078_v3 }
 0x18d   :  { %864 = vmatpush1.bf16.msra.mxu0 %v2439_v29  ;;  %1902 = vmatpush3.bf16.msra.mxu1 %v2465_v38 }
 0x18e   :  { %865 = vmatprep.subr.bf16.mxu0 %v2442_v30  ;;  %1903 = vmatprep.subr.bf16.mxu1 %v3078_v3 }
 0x191   :  { %866 = vmatpush1.bf16.msra.mxu0 %v2447_v33  ;;  %1904 = vmatpush3.bf16.msra.mxu1 %v2475_v42 }
 0x192   :  { %867 = vmatprep.subr.bf16.mxu0 %v2450_v34  ;;  %1905 = vmatprep.subr.bf16.mxu1 %v3078_v3 }
 0x195   :  { %868 = vmatpush1.bf16.msra.mxu0 %v2457_v36  ;;  %1906 = vmatpush3.bf16.msra.mxu1 %v2488_v45 }
 0x196   :  { %869 = vmatprep.subr.bf16.mxu0 %v2460_v37  ;;  %1907 = vmatprep.subr.bf16.mxu1 %v3078_v3 }
 0x199   :  { %870 = vmatpush1.bf16.msra.mxu0 %v2469_v40  ;;  %1908 = vmatpush3.bf16.msra.mxu1 %v2498_v49 }
 0x19a   :  { %871 = vmatprep.subr.bf16.mxu0 %v2472_v41  ;;  %1909 = vmatprep.subr.bf16.mxu1 %v3078_v3 }
 0x19d   :  { %872 = vmatpush1.bf16.msra.mxu0 %v2480_v43  ;;  %1910 = vmatpush3.bf16.msra.mxu1 %v2509_v51 }
 0x19e   :  { %873 = vmatprep.subr.bf16.mxu0 %v2483_v44  ;;  %1911 = vmatprep.subr.bf16.mxu1 %v3078_v3 }
 0x1a1   :  { %874 = vmatpush1.bf16.msra.mxu0 %v2492_v47  ;;  %1912 = vmatpush3.bf16.msra.mxu1 %v2515_v53 }
 0x1a2   :  { %875 = vmatprep.subr.bf16.mxu0 %v2495_v48  ;;  %1913 = vmatprep.subr.bf16.mxu1 %v3078_v3 }
 0x1a5   :  { %876 = vmatpush1.bf16.msra.mxu0 %v2503_v50  ;;  %1914 = vmatpush3.bf16.msra.mxu1 %v2522_v54 }
 0x1a6   :  { %972 = vmatprep.subr.bf16.mxu0 %v2429_v23  ;;  %1919 = vmatprep.subr.bf16.mxu1 %v3078_v3 }
 0x25b   :  { %v784_v56 = vpop.f32.mrb[24].mxu0  ;;  %v825_v0 = vpop.f32.mrb[24].mxu1 }
 0x25c   :  { %v785_v28 = vadd.f32 %v784_v56, %v2631_v25  ;;  %v786_v55 = vpop.f32.mrb[25].mxu0  ;;  %v1897_v61 = vpop.f32.mrb[25].mxu1  ;;  %v826_v56 = vadd.f32 %v825_v0, %v2649_v10  ;;  %v322_v0 = vadd.f32 %v2576_v63, %v2629_v20 }
 0x25d   :  { %v787_v18 = vadd.f32 %v786_v55, %v2638_v1  ;;  %v788_v24 = vpop.f32.mrb[26].mxu0  ;;  %v828_v22 = vpop.f32.mrb[26].mxu1 }
 0x25e   :  { %v831_v21 = vadd.f32 %v785_v28, %v316_v57  ;;  %v789_v15 = vpop.f32.mrb[27].mxu0  ;;  %v1898_v13 = vpop.f32.mrb[27].mxu1 }
 0x25f   :  { %v832_v46 = vadd.f32 %v787_v18, %v318_v14 }
 0x260   :  { %v1713_v32 = vmul.f32 -1.442695, %v831_v21 }
 0x261   :  { %v1714_v17 = vmul.f32 -1.442695, %v832_v46 }
 0x262   :  { %2137 = vpow2.f32 %v1713_v32  ;;  %v324_v32 = vadd.f32 %v2578_v2, %v2636_v52 }
 0x263   :  { %2139 = vpow2.f32 %v1714_v17 }
 0x26c   :  { %v2138_v58 = vpop.eup %2137 }
 0x26d   :  { %v839_v62 = vadd.f32 1.0, %v2138_v58  ;;  %v2140_v7 = vpop.eup %2139 }
 0x26e   :  { %v840_v8 = vadd.f32 1.0, %v2140_v7 }
 0x26f   :  { %2141 = vrcp.f32 %v839_v62 }
 0x270   :  { %2143 = vrcp.f32 %v840_v8 }
 0x279   :  { %v2142_v60 = vpop.eup %2141 }
 0x27a   :  { %v845_v61 = vmul.f32 %v2142_v60, %v826_v56  ;;  %v2144_v57 = vpop.eup %2143 }
 0x27b   :  { %v848_v28 = vsub.f32 1.0, %v2144_v57  ;;  %v850_v24 = vmul.f32 %v2144_v57, %v2654_v59 }
 0x27c   :  { %v846_v55 = vadd.f32 %v845_v61, %v2591_v9 }
 0x27e   :  { %2145 = vtanh.f32 %v846_v55 }
 0x288   :  { %v2146_v14 = vpop.eup %2145 }
 0x289   :  { %v849_v18 = vmul.f32 %v2146_v14, %v848_v28 }
 0x28b   :  { %v2702_v22 = vadd.f32 %v850_v24, %v849_v18 }
 0x28d   :  { %v852_v21 = vpack.c.bf16 %v2702_v22, %v2702_v22 }
 0x28f   :  { %854 = vst [vmem:[#allocation9 + $0x4] sm:$0xf] %v852_v21  ;;  %894 = vmatmul.mubr.bf16.vlgmr.msra.gmra.mrb[28].mxu0 %v852_v21  ;;  %1916 = vmatmul.mubr.bf16.vlgmr.msra.gmra.mrb[28].mxu1 %v852_v21 }
 0x290   :  { %973 = vmatpush1.bf16.msra.mxu0 %v2432_v26  ;;  %1920 = vmatpush3.bf16.msra.mxu1 %v2453_v35 }
 0x291   :  { %974 = vmatprep.subr.bf16.mxu0 %v2435_v27  ;;  %1921 = vmatprep.subr.bf16.mxu1 %v3078_v3 }
 0x292   :  { %1004 = vmatprep.mubr.bf16.mxu0 %v3079_v5  ;;  %1935 = vmatprep.mubr.msk.bf16.mxu1 %vm2344_vm0, %v3078_v3 }
 0x294   :  { %975 = vmatpush1.bf16.msra.mxu0 %v2439_v29  ;;  %1922 = vmatpush3.bf16.msra.mxu1 %v2465_v38 }
 0x295   :  { %976 = vmatprep.subr.bf16.mxu0 %v2442_v30  ;;  %1923 = vmatprep.subr.bf16.mxu1 %v3078_v3 }
 0x298   :  { %977 = vmatpush1.bf16.msra.mxu0 %v2447_v33  ;;  %1924 = vmatpush3.bf16.msra.mxu1 %v2475_v42 }
 0x299   :  { %978 = vmatprep.subr.bf16.mxu0 %v2450_v34  ;;  %1925 = vmatprep.subr.bf16.mxu1 %v3078_v3 }
 0x29c   :  { %979 = vmatpush1.bf16.msra.mxu0 %v2457_v36  ;;  %1926 = vmatpush3.bf16.msra.mxu1 %v2488_v45 }
 0x29d   :  { %980 = vmatprep.subr.bf16.mxu0 %v2460_v37  ;;  %1927 = vmatprep.subr.bf16.mxu1 %v3078_v3 }
 0x2a0   :  { %981 = vmatpush1.bf16.msra.mxu0 %v2469_v40  ;;  %1928 = vmatpush3.bf16.msra.mxu1 %v2498_v49 }
 0x2a1   :  { %982 = vmatprep.subr.bf16.mxu0 %v2472_v41  ;;  %1929 = vmatprep.subr.bf16.mxu1 %v3078_v3 }
 0x2a4   :  { %983 = vmatpush1.bf16.msra.mxu0 %v2480_v43  ;;  %1930 = vmatpush3.bf16.msra.mxu1 %v2509_v51 }
 0x2a5   :  { %984 = vmatprep.subr.bf16.mxu0 %v2483_v44  ;;  %1931 = vmatprep.subr.bf16.mxu1 %v3078_v3 }
 0x2a8   :  { %985 = vmatpush1.bf16.msra.mxu0 %v2492_v47  ;;  %1932 = vmatpush3.bf16.msra.mxu1 %v2515_v53 }
 0x2a9   :  { %986 = vmatprep.subr.bf16.mxu0 %v2495_v48  ;;  %1933 = vmatprep.subr.bf16.mxu1 %v3078_v3 }
 0x2ac   :  { %987 = vmatpush1.bf16.msra.mxu0 %v2503_v50  ;;  %1934 = vmatpush3.bf16.msra.mxu1 %v2522_v54 }
 0x2ad   :  { %1083 = vmatprep.subr.bf16.mxu0 %v2429_v23  ;;  %1939 = vmatprep.subr.bf16.mxu1 %v3078_v3 }
 0x362   :  { %v895_v9 = vpop.f32.mrb[28].mxu0  ;;  %v936_v59 = vpop.f32.mrb[28].mxu1 }
 0x363   :  { %v896_v15 = vadd.f32 %v895_v9, %v2631_v25  ;;  %v897_v13 = vpop.f32.mrb[29].mxu0  ;;  %v1917_v46 = vpop.f32.mrb[29].mxu1  ;;  %v937_v18 = vadd.f32 %v936_v59, %v2649_v10  ;;  %v326_v59 = vadd.f32 %v2584_v4, %v2629_v20 }
 0x364   :  { %v898_v17 = vadd.f32 %v897_v13, %v2638_v1  ;;  %v899_v58 = vpop.f32.mrb[30].mxu0  ;;  %v939_v62 = vpop.f32.mrb[30].mxu1 }
 0x365   :  { %v942_v7 = vadd.f32 %v896_v15, %v322_v0  ;;  %v900_v8 = vpop.f32.mrb[31].mxu0  ;;  %v1918_v56 = vpop.f32.mrb[31].mxu1 }
 0x366   :  { %v943_v60 = vadd.f32 %v898_v17, %v324_v32  ;;  %v328_v8 = vadd.f32 %v2588_v6, %v2636_v52 }
 0x367   :  { %v1715_v61 = vmul.f32 -1.442695, %v942_v7 }
 0x368   :  { %v1716_v55 = vmul.f32 -1.442695, %v943_v60 }
 0x369   :  { %2147 = vpow2.f32 %v1715_v61 }
 0x36a   :  { %2149 = vpow2.f32 %v1716_v55 }
 0x373   :  { %v2148_v63 = vpop.eup %2147 }
 0x374   :  { %v950_v57 = vadd.f32 1.0, %v2148_v63  ;;  %v2150_v28 = vpop.eup %2149 }
 0x375   :  { %v951_v14 = vadd.f32 1.0, %v2150_v28 }
 0x376   :  { %2151 = vrcp.f32 %v950_v57 }
 0x377   :  { %2153 = vrcp.f32 %v951_v14 }
 0x380   :  { %v2152_v2 = vpop.eup %2151 }
 0x381   :  { %v956_v24 = vmul.f32 %v2152_v2, %v937_v18  ;;  %v2154_v9 = vpop.eup %2153 }
 0x382   :  { %v959_v0 = vsub.f32 1.0, %v2154_v9  ;;  %v961_v46 = vmul.f32 %v2154_v9, %v2702_v22 }
 0x383   :  { %v957_v21 = vadd.f32 %v956_v24, %v2602_v16 }
 0x385   :  { %2155 = vtanh.f32 %v957_v21 }
 0x38f   :  { %v2156_v15 = vpop.eup %2155 }
 0x390   :  { %v960_v13 = vmul.f32 %v2156_v15, %v959_v0 }
 0x392   :  { %v2750_v32 = vadd.f32 %v961_v46, %v960_v13 }
 0x394   :  { %v963_v17 = vpack.c.bf16 %v2750_v32, %v2750_v32 }
 0x396   :  { %965 = vst [vmem:[#allocation9 + $0x8] sm:$0xf] %v963_v17  ;;  %1005 = vmatmul.mubr.bf16.vlgmr.msra.gmra.mrb[32].mxu0 %v963_v17  ;;  %1936 = vmatmul.mubr.bf16.vlgmr.msra.gmra.mrb[32].mxu1 %v963_v17 }
 0x397   :  { %1084 = vmatpush1.bf16.msra.mxu0 %v2432_v26  ;;  %1940 = vmatpush3.bf16.msra.mxu1 %v2453_v35 }
 0x398   :  { %1085 = vmatprep.subr.bf16.mxu0 %v2435_v27  ;;  %1941 = vmatprep.subr.bf16.mxu1 %v3078_v3 }
 0x399   :  { %1115 = vmatprep.mubr.bf16.mxu0 %v3079_v5  ;;  %1955 = vmatprep.mubr.msk.bf16.mxu1 %vm2344_vm0, %v3078_v3 }
 0x39b   :  { %1086 = vmatpush1.bf16.msra.mxu0 %v2439_v29  ;;  %1942 = vmatpush3.bf16.msra.mxu1 %v2465_v38 }
 0x39c   :  { %1087 = vmatprep.subr.bf16.mxu0 %v2442_v30  ;;  %1943 = vmatprep.subr.bf16.mxu1 %v3078_v3 }
 0x39f   :  { %1088 = vmatpush1.bf16.msra.mxu0 %v2447_v33  ;;  %1944 = vmatpush3.bf16.msra.mxu1 %v2475_v42 }
 0x3a0   :  { %1089 = vmatprep.subr.bf16.mxu0 %v2450_v34  ;;  %1945 = vmatprep.subr.bf16.mxu1 %v3078_v3 }
 0x3a3   :  { %1090 = vmatpush1.bf16.msra.mxu0 %v2457_v36  ;;  %1946 = vmatpush3.bf16.msra.mxu1 %v2488_v45 }
 0x3a4   :  { %1091 = vmatprep.subr.bf16.mxu0 %v2460_v37  ;;  %1947 = vmatprep.subr.bf16.mxu1 %v3078_v3 }
 0x3a7   :  { %1092 = vmatpush1.bf16.msra.mxu0 %v2469_v40  ;;  %1948 = vmatpush3.bf16.msra.mxu1 %v2498_v49 }
 0x3a8   :  { %1093 = vmatprep.subr.bf16.mxu0 %v2472_v41  ;;  %1949 = vmatprep.subr.bf16.mxu1 %v3078_v3 }
 0x3ab   :  { %1094 = vmatpush1.bf16.msra.mxu0 %v2480_v43  ;;  %1950 = vmatpush3.bf16.msra.mxu1 %v2509_v51 }
 0x3ac   :  { %1095 = vmatprep.subr.bf16.mxu0 %v2483_v44  ;;  %1951 = vmatprep.subr.bf16.mxu1 %v3078_v3 }
 0x3af   :  { %1096 = vmatpush1.bf16.msra.mxu0 %v2492_v47  ;;  %1952 = vmatpush3.bf16.msra.mxu1 %v2515_v53 }
 0x3b0   :  { %1097 = vmatprep.subr.bf16.mxu0 %v2495_v48  ;;  %1953 = vmatprep.subr.bf16.mxu1 %v3078_v3 }
 0x3b3   :  { %1098 = vmatpush1.bf16.msra.mxu0 %v2503_v50  ;;  %1954 = vmatpush3.bf16.msra.mxu1 %v2522_v54 }
 0x3b4   :  { %1194 = vmatprep.subr.bf16.mxu0 %v2429_v23  ;;  %1959 = vmatprep.subr.bf16.mxu1 %v3078_v3 }
 0x469   :  { %v1006_v16 = vpop.f32.mrb[32].mxu0  ;;  %v1047_v22 = vpop.f32.mrb[32].mxu1 }
 0x46a   :  { %v1007_v58 = vadd.f32 %v1006_v16, %v2631_v25  ;;  %v1008_v62 = vpop.f32.mrb[33].mxu0  ;;  %v1937_v7 = vpop.f32.mrb[33].mxu1  ;;  %v1048_v9 = vadd.f32 %v1047_v22, %v2649_v10 }
 0x46b   :  { %v1009_v56 = vadd.f32 %v1008_v62, %v2638_v1  ;;  %v1010_v60 = vpop.f32.mrb[34].mxu0  ;;  %v1050_v61 = vpop.f32.mrb[34].mxu1 }
 0x46c   :  { %v1053_v55 = vadd.f32 %v1007_v58, %v326_v59  ;;  %v1011_v63 = vpop.f32.mrb[35].mxu0  ;;  %v1938_v57 = vpop.f32.mrb[35].mxu1 }
 0x46d   :  { %v1054_v28 = vadd.f32 %v1009_v56, %v328_v8 }
 0x46e   :  { %v1717_v14 = vmul.f32 -1.442695, %v1053_v55 }
 0x46f   :  { %v1718_v18 = vmul.f32 -1.442695, %v1054_v28 }
 0x470   :  { %2157 = vpow2.f32 %v1717_v14 }
 0x471   :  { %2159 = vpow2.f32 %v1718_v18 }
 0x47a   :  { %v2158_v4 = vpop.eup %2157 }
 0x47b   :  { %v1061_v2 = vadd.f32 1.0, %v2158_v4  ;;  %v2160_v24 = vpop.eup %2159 }
 0x47c   :  { %v1062_v21 = vadd.f32 1.0, %v2160_v24 }
 0x47d   :  { %2161 = vrcp.f32 %v1061_v2 }
 0x47e   :  { %2163 = vrcp.f32 %v1062_v21 }
 0x487   :  { %v2162_v6 = vpop.eup %2161 }
 0x488   :  { %v1067_v0 = vmul.f32 %v2162_v6, %v1048_v9  ;;  %v2164_v13 = vpop.eup %2163 }
 0x489   :  { %v1070_v46 = vsub.f32 1.0, %v2164_v13  ;;  %v1072_v59 = vmul.f32 %v2164_v13, %v2750_v32  ;;  %v334_v32 = vadd.f32 %v2595_v12, %v2636_v52 }
 0x48a   :  { %v1068_v15 = vadd.f32 %v1067_v0, %v2605_v19 }
 0x48c   :  { %2165 = vtanh.f32 %v1068_v15 }
 0x496   :  { %v2166_v17 = vpop.eup %2165 }
 0x497   :  { %v1071_v16 = vmul.f32 %v2166_v17, %v1070_v46  ;;  %v2850_v46 = vld [vmem:[#allocation8] ss:$12 sps:$4 sm:$0xff]   ;;  %v2861_v17 = vld [vmem:[#allocation8 + $0x18] ss:$12 sps:$4 sm:$0xff]  }
 0x499   :  { %v2798_v58 = vadd.f32 %v1072_v59, %v1071_v16  ;;  %v2865_v16 = vld [vmem:[#allocation8 + $0x34] ss:$12 sps:$4 sm:$0xff]  }
 0x49b   :  { %v1074_v62 = vpack.c.bf16 %v2798_v58, %v2798_v58 }
 0x49d   :  { %1076 = vst [vmem:[#allocation9 + $0xc] sm:$0xf] %v1074_v62  ;;  %1116 = vmatmul.mubr.bf16.vlgmr.msra.gmra.mrb[36].mxu0 %v1074_v62  ;;  %1956 = vmatmul.mubr.bf16.vlgmr.msra.gmra.mrb[36].mxu1 %v1074_v62 }
 0x49e   :  { %1195 = vmatpush1.bf16.msra.mxu0 %v2432_v26  ;;  %1960 = vmatpush3.bf16.msra.mxu1 %v2453_v35 }
 0x49f   :  { %1196 = vmatprep.subr.bf16.mxu0 %v2435_v27  ;;  %1961 = vmatprep.subr.bf16.mxu1 %v3078_v3 }
 0x4a0   :  { %1226 = vmatprep.mubr.bf16.mxu0 %v3079_v5  ;;  %1975 = vmatprep.mubr.msk.bf16.mxu1 %vm2344_vm0, %v3078_v3 }
 0x4a2   :  { %1197 = vmatpush1.bf16.msra.mxu0 %v2439_v29  ;;  %1962 = vmatpush3.bf16.msra.mxu1 %v2465_v38  ;;  %v332_v29 = vadd.f32 %v2593_v11, %v2629_v20 }
 0x4a3   :  { %1198 = vmatprep.subr.bf16.mxu0 %v2442_v30  ;;  %1963 = vmatprep.subr.bf16.mxu1 %v3078_v3 }
 0x4a6   :  { %1199 = vmatpush1.bf16.msra.mxu0 %v2447_v33  ;;  %1964 = vmatpush3.bf16.msra.mxu1 %v2475_v42 }
 0x4a7   :  { %1200 = vmatprep.subr.bf16.mxu0 %v2450_v34  ;;  %1965 = vmatprep.subr.bf16.mxu1 %v3078_v3 }
 0x4aa   :  { %1201 = vmatpush1.bf16.msra.mxu0 %v2457_v36  ;;  %1966 = vmatpush3.bf16.msra.mxu1 %v2488_v45 }
 0x4ab   :  { %1202 = vmatprep.subr.bf16.mxu0 %v2460_v37  ;;  %1967 = vmatprep.subr.bf16.mxu1 %v3078_v3 }
 0x4ae   :  { %1203 = vmatpush1.bf16.msra.mxu0 %v2469_v40  ;;  %1968 = vmatpush3.bf16.msra.mxu1 %v2498_v49 }
 0x4af   :  { %1204 = vmatprep.subr.bf16.mxu0 %v2472_v41  ;;  %1969 = vmatprep.subr.bf16.mxu1 %v3078_v3 }
 0x4b2   :  { %1205 = vmatpush1.bf16.msra.mxu0 %v2480_v43  ;;  %1970 = vmatpush3.bf16.msra.mxu1 %v2509_v51 }
 0x4b3   :  { %1206 = vmatprep.subr.bf16.mxu0 %v2483_v44  ;;  %1971 = vmatprep.subr.bf16.mxu1 %v3078_v3 }
 0x4b6   :  { %1207 = vmatpush1.bf16.msra.mxu0 %v2492_v47  ;;  %1972 = vmatpush3.bf16.msra.mxu1 %v2515_v53 }
 0x4b7   :  { %1208 = vmatprep.subr.bf16.mxu0 %v2495_v48  ;;  %1973 = vmatprep.subr.bf16.mxu1 %v3078_v3 }
 0x4ba   :  { %1209 = vmatpush1.bf16.msra.mxu0 %v2503_v50  ;;  %1974 = vmatpush3.bf16.msra.mxu1 %v2522_v54 }
 0x4bb   :  { %1305 = vmatprep.subr.bf16.mxu0 %v2429_v23  ;;  %1979 = vmatprep.subr.bf16.mxu1 %v3078_v3 }
 0x570   :  { %v1117_v26 = vpop.f32.mrb[36].mxu0  ;;  %v1158_v27 = vpop.f32.mrb[36].mxu1 }
 0x571   :  { %v1118_v30 = vadd.f32 %v1117_v26, %v2631_v25  ;;  %v1119_v33 = vpop.f32.mrb[37].mxu0  ;;  %v1957_v19 = vpop.f32.mrb[37].mxu1  ;;  %v1159_v18 = vadd.f32 %v1158_v27, %v2649_v10 }
 0x572   :  { %v1120_v22 = vadd.f32 %v1119_v33, %v2638_v1  ;;  %v1121_v7 = vpop.f32.mrb[38].mxu0  ;;  %v1161_v8 = vpop.f32.mrb[38].mxu1 }
 0x573   :  { %v1164_v56 = vadd.f32 %v1118_v30, %v332_v29  ;;  %v1122_v23 = vpop.f32.mrb[39].mxu0  ;;  %v1958_v60 = vpop.f32.mrb[39].mxu1 }
 0x574   :  { %v1165_v61 = vadd.f32 %v1120_v22, %v334_v32  ;;  %v3082_v32 = vld [vmem:[#allocation19_spill] sm:$0xff] }
 0x575   :  { %v1719_v55 = vmul.f32 -1.442695, %v1164_v56 }
 0x576   :  { %v1720_v63 = vmul.f32 -1.442695, %v1165_v61 }
 0x577   :  { %2167 = vpow2.f32 %v1719_v55 }
 0x578   :  { %2169 = vpow2.f32 %v1720_v63  ;;  %v2911_v63 = vld [vmem:[#allocation8 + $0x8] ss:$12 sps:$4 sm:$0xff]  }
 0x581   :  { %v2168_v11 = vpop.eup %2167 }
 0x582   :  { %v1172_v57 = vadd.f32 1.0, %v2168_v11  ;;  %v2170_v28 = vpop.eup %2169  ;;  %v2920_v11 = vld [vmem:[#allocation8 + $0x20] ss:$12 sps:$4 sm:$0xff]  }
 0x583   :  { %v1173_v14 = vadd.f32 1.0, %v2170_v28  ;;  %v2929_v28 = vld [vmem:[#allocation8 + $0x4c] ss:$12 sps:$4 sm:$0xff]  }
 0x584   :  { %2171 = vrcp.f32 %v1172_v57  ;;  %v2926_v57 = vld [vmem:[#allocation8 + $0x38] ss:$12 sps:$4 sm:$0xff]  }
 0x585   :  { %2173 = vrcp.f32 %v1173_v14  ;;  %v2933_v14 = vld [vmem:[#allocation8 + $0x48] ss:$12 sps:$4 sm:$0xff]  }
 0x58e   :  { %v2172_v12 = vpop.eup %2171 }
 0x58f   :  { %v1178_v4 = vmul.f32 %v2172_v12, %v1159_v18  ;;  %v2174_v24 = vpop.eup %2173  ;;  %v2936_v18 = vld [vmem:[#allocation8 + $0x50] ss:$12 sps:$4 sm:$0xff]  }
 0x590   :  { %v1181_v21 = vsub.f32 1.0, %v2174_v24  ;;  %v1183_v0 = vmul.f32 %v2174_v24, %v2798_v58  ;;  %v2939_v12 = vld [vmem:[#allocation8 + $0x64] ss:$12 sps:$4 sm:$0xff]   ;;  %v2949_v24 = vld [vmem:[#allocation8 + $0x7c] ss:$12 sps:$4 sm:$0xff]  }
 0x591   :  { %v1179_v2 = vadd.f32 %v1178_v4, %v2616_v31  ;;  %v2854_v31 = vld [vmem:[#allocation8 + $0x1c] ss:$12 sps:$4 sm:$0xff]   ;;  %v2943_v4 = vld [vmem:[#allocation8 + $0x60] ss:$12 sps:$4 sm:$0xff]  }
 0x593   :  { %2175 = vtanh.f32 %v1179_v2  ;;  %v2946_v2 = vld [vmem:[#allocation8 + $0x68] ss:$12 sps:$4 sm:$0xff]  }
 0x59d   :  { %v2176_v9 = vpop.eup %2175 }
 0x59e   :  { %v1182_v6 = vmul.f32 %v2176_v9, %v1181_v21  ;;  %v2953_v21 = vld [vmem:[#allocation8 + $0x78] ss:$12 sps:$4 sm:$0xff]   ;;  %v2956_v9 = vld [vmem:[#allocation8 + $0x80] ss:$12 sps:$4 sm:$0xff]  }
 0x5a0   :  { %v2846_v15 = vadd.f32 %v1183_v0, %v1182_v6  ;;  %v2959_v6 = vld [vmem:[#allocation8 + $0x94] ss:$12 sps:$4 sm:$0xff]   ;;  %v2963_v0 = vld [vmem:[#allocation8 + $0x90] ss:$12 sps:$4 sm:$0xff]  }
 0x5a2   :  { %v1185_v13 = vpack.c.bf16 %v2846_v15, %v2846_v15 }
 0x5a4   :  { %1187 = vst [vmem:[#allocation9 + $0x10] sm:$0xf] %v1185_v13  ;;  %1227 = vmatmul.mubr.bf16.vlgmr.msra.gmra.mrb[40].mxu0 %v1185_v13  ;;  %1976 = vmatmul.mubr.bf16.vlgmr.msra.gmra.mrb[40].mxu1 %v1185_v13  ;;  %v2969_v13 = vld [vmem:[#allocation8 + $0xac] ss:$12 sps:$4 sm:$0xff]  }
 0x5a5   :  { %1306 = vmatpush1.bf16.msra.mxu0 %v2850_v46  ;;  %1980 = vmatpush3.bf16.msra.mxu1 %v2453_v35  ;;  %v2869_v35 = vld [vmem:[#allocation8 + $0x30] ss:$12 sps:$4 sm:$0xff]  }
 0x5a6   :  { %1307 = vmatprep.subr.bf16.mxu0 %v2854_v31  ;;  %1981 = vmatprep.subr.bf16.mxu1 %v3078_v3 }
 0x5a7   :  { %1337 = vmatprep.mubr.bf16.mxu0 %v3079_v5  ;;  %1995 = vmatprep.mubr.msk.bf16.mxu1 %vm2344_vm0, %v3078_v3 }
 0x5a9   :  { %1308 = vmatpush1.bf16.msra.mxu0 %v2861_v17  ;;  %1982 = vmatpush3.bf16.msra.mxu1 %v2465_v38  ;;  %v3080_v38 = vld [vmem:[#allocation13_spill] sm:$0xff] }
 0x5aa   :  { %1309 = vmatprep.subr.bf16.mxu0 %v2865_v16  ;;  %1983 = vmatprep.subr.bf16.mxu1 %v3078_v3 }
 0x5ad   :  { %1310 = vmatpush1.bf16.msra.mxu0 %v2869_v35  ;;  %1984 = vmatpush3.bf16.msra.mxu1 %v2475_v42 }
 0x5ae   :  { %1311 = vmatprep.subr.bf16.mxu0 %v2450_v34  ;;  %1985 = vmatprep.subr.bf16.mxu1 %v3078_v3  ;;  %v2893_v34 = vld [vmem:[#allocation8 + $0x4] ss:$12 sps:$4 sm:$0xff]  }
 0x5b1   :  { %1312 = vmatpush1.bf16.msra.mxu0 %v2457_v36  ;;  %1986 = vmatpush3.bf16.msra.mxu1 %v2488_v45 }
 0x5b2   :  { %1313 = vmatprep.subr.bf16.mxu0 %v2460_v37  ;;  %1987 = vmatprep.subr.bf16.mxu1 %v3078_v3 }
 0x5b5   :  { %1314 = vmatpush1.bf16.msra.mxu0 %v2469_v40  ;;  %1988 = vmatpush3.bf16.msra.mxu1 %v2498_v49  ;;  %v336_v40 = vadd.f32 %v3080_v38, %v2629_v20 }
 0x5b6   :  { %1315 = vmatprep.subr.bf16.mxu0 %v2472_v41  ;;  %1989 = vmatprep.subr.bf16.mxu1 %v3078_v3 }
 0x5b9   :  { %1316 = vmatpush1.bf16.msra.mxu0 %v2480_v43  ;;  %1990 = vmatpush3.bf16.msra.mxu1 %v2509_v51 }
 0x5ba   :  { %1317 = vmatprep.subr.bf16.mxu0 %v2483_v44  ;;  %1991 = vmatprep.subr.bf16.mxu1 %v3078_v3  ;;  %v3081_v44 = vld [vmem:[#allocation14_spill] sm:$0xff] }
 0x5bb   :  { %v338_v45 = vadd.f32 %v3081_v44, %v2636_v52 }
 0x5bd   :  { %1318 = vmatpush1.bf16.msra.mxu0 %v2492_v47  ;;  %1992 = vmatpush3.bf16.msra.mxu1 %v2515_v53 }
 0x5be   :  { %1319 = vmatprep.subr.bf16.mxu0 %v2495_v48  ;;  %1993 = vmatprep.subr.bf16.mxu1 %v3078_v3 }
 0x5c1   :  { %1320 = vmatpush1.bf16.msra.mxu0 %v2503_v50  ;;  %1994 = vmatpush3.bf16.msra.mxu1 %v2522_v54 }
 0x5c2   :  { %1416 = vmatprep.subr.bf16.mxu0 %v2893_v34  ;;  %1999 = vmatprep.subr.bf16.mxu1 %v3078_v3 }
 0x677   :  { %v1228_v36 = vpop.f32.mrb[40].mxu0  ;;  %v1269_v37 = vpop.f32.mrb[40].mxu1 }
 0x678   :  { %v1229_v41 = vadd.f32 %v1228_v36, %v2631_v25  ;;  %v1230_v42 = vpop.f32.mrb[41].mxu0  ;;  %v1977_v43 = vpop.f32.mrb[41].mxu1  ;;  %v1270_v30 = vadd.f32 %v1269_v37, %v2649_v10  ;;  %v2973_v36 = vld [vmem:[#allocation8 + $0xa8] ss:$12 sps:$4 sm:$0xff]   ;;  %v2976_v37 = vld [vmem:[#allocation8 + $0xb0] ss:$12 sps:$4 sm:$0xff]  }
 0x679   :  { %v1231_v47 = vadd.f32 %v1230_v42, %v2638_v1  ;;  %v1232_v48 = vpop.f32.mrb[42].mxu0  ;;  %v1272_v49 = vpop.f32.mrb[42].mxu1 }
 0x67a   :  { %v1275_v50 = vadd.f32 %v1229_v41, %v336_v40  ;;  %v1233_v51 = vpop.f32.mrb[43].mxu0  ;;  %v1978_v53 = vpop.f32.mrb[43].mxu1  ;;  %v3083_v41 = vld [vmem:[#allocation15_spill] sm:$0xff] }
 0x67b   :  { %v1276_v54 = vadd.f32 %v1231_v47, %v338_v45  ;;  %v342_v42 = vadd.f32 %v3083_v41, %v2629_v20  ;;  %v3084_v47 = vld [vmem:[#allocation16_spill] sm:$0xff] }
 0x67c   :  { %v1721_v59 = vmul.f32 -1.442695, %v1275_v50  ;;  %v344_v48 = vadd.f32 %v3084_v47, %v2636_v52 }
 0x67d   :  { %v1722_v58 = vmul.f32 -1.442695, %v1276_v54 }
 0x67e   :  { %2177 = vpow2.f32 %v1721_v59 }
 0x67f   :  { %2179 = vpow2.f32 %v1722_v58 }
 0x688   :  { %v2178_v62 = vpop.eup %2177 }
 0x689   :  { %v1283_v26 = vadd.f32 1.0, %v2178_v62  ;;  %v2180_v27 = vpop.eup %2179 }
 0x68a   :  { %v1284_v29 = vadd.f32 1.0, %v2180_v27 }
 0x68b   :  { %2181 = vrcp.f32 %v1283_v26 }
 0x68c   :  { %2183 = vrcp.f32 %v1284_v29 }
 0x695   :  { %v2182_v33 = vpop.eup %2181 }
 0x696   :  { %v1289_v19 = vmul.f32 %v2182_v33, %v1270_v30  ;;  %v2184_v7 = vpop.eup %2183 }
 0x697   :  { %v1292_v8 = vsub.f32 1.0, %v2184_v7  ;;  %v1294_v60 = vmul.f32 %v2184_v7, %v2846_v15  ;;  %v2966_v15 = vld [vmem:[#allocation8 + $0x98] ss:$12 sps:$4 sm:$0xff]  }
 0x698   :  { %v1290_v22 = vadd.f32 %v1289_v19, %v3082_v32 }
 0x69a   :  { %2185 = vtanh.f32 %v1290_v22  ;;  %v3085_v22 = vld [vmem:[#allocation20_spill] sm:$0xff] }
 0x6a4   :  { %v2186_v56 = vpop.eup %2185 }
 0x6a5   :  { %v1293_v23 = vmul.f32 %v2186_v56, %v1292_v8 }
 0x6a7   :  { %v2906_v61 = vadd.f32 %v1294_v60, %v1293_v23 }
 0x6a9   :  { %v1296_v55 = vpack.c.bf16 %v2906_v61, %v2906_v61 }
 0x6ab   :  { %1298 = vst [vmem:[#allocation9 + $0x14] sm:$0xf] %v1296_v55  ;;  %1338 = vmatmul.mubr.bf16.vlgmr.msra.gmra.mrb[44].mxu0 %v1296_v55  ;;  %1996 = vmatmul.mubr.bf16.vlgmr.msra.gmra.mrb[44].mxu1 %v1296_v55 }
 0x6ac   :  { %1417 = vmatpush1.bf16.msra.mxu0 %v2850_v46  ;;  %2000 = vmatpush3.bf16.msra.mxu1 %v2911_v63 }
 0x6ad   :  { %1418 = vmatprep.subr.bf16.mxu0 %v2854_v31  ;;  %2001 = vmatprep.subr.bf16.mxu1 %v3078_v3 }
 0x6ae   :  { %1448 = vmatprep.mubr.bf16.mxu0 %v3079_v5  ;;  %2015 = vmatprep.mubr.msk.bf16.mxu1 %vm2344_vm0, %v3078_v3 }
 0x6b0   :  { %1419 = vmatpush1.bf16.msra.mxu0 %v2861_v17  ;;  %2002 = vmatpush3.bf16.msra.mxu1 %v2920_v11 }
 0x6b1   :  { %1420 = vmatprep.subr.bf16.mxu0 %v2865_v16  ;;  %2003 = vmatprep.subr.bf16.mxu1 %v3078_v3 }
 0x6b4   :  { %1421 = vmatpush1.bf16.msra.mxu0 %v2869_v35  ;;  %2004 = vmatpush3.bf16.msra.mxu1 %v2926_v57 }
 0x6b5   :  { %1422 = vmatprep.subr.bf16.mxu0 %v2929_v28  ;;  %2005 = vmatprep.subr.bf16.mxu1 %v3078_v3 }
 0x6b8   :  { %1423 = vmatpush1.bf16.msra.mxu0 %v2933_v14  ;;  %2006 = vmatpush3.bf16.msra.mxu1 %v2936_v18 }
 0x6b9   :  { %1424 = vmatprep.subr.bf16.mxu0 %v2939_v12  ;;  %2007 = vmatprep.subr.bf16.mxu1 %v3078_v3 }
 0x6bc   :  { %1425 = vmatpush1.bf16.msra.mxu0 %v2943_v4  ;;  %2008 = vmatpush3.bf16.msra.mxu1 %v2946_v2 }
 0x6bd   :  { %1426 = vmatprep.subr.bf16.mxu0 %v2949_v24  ;;  %2009 = vmatprep.subr.bf16.mxu1 %v3078_v3 }
 0x6c0   :  { %1427 = vmatpush1.bf16.msra.mxu0 %v2953_v21  ;;  %2010 = vmatpush3.bf16.msra.mxu1 %v2956_v9 }
 0x6c1   :  { %1428 = vmatprep.subr.bf16.mxu0 %v2959_v6  ;;  %2011 = vmatprep.subr.bf16.mxu1 %v3078_v3 }
 0x6c4   :  { %1429 = vmatpush1.bf16.msra.mxu0 %v2963_v0  ;;  %2012 = vmatpush3.bf16.msra.mxu1 %v2966_v15 }
 0x6c5   :  { %1430 = vmatprep.subr.bf16.mxu0 %v2969_v13  ;;  %2013 = vmatprep.subr.bf16.mxu1 %v3078_v3 }
 0x6c8   :  { %1431 = vmatpush1.bf16.msra.mxu0 %v2973_v36  ;;  %2014 = vmatpush3.bf16.msra.mxu1 %v2976_v37 }
 0x6c9   :  { %1527 = vmatprep.subr.bf16.mxu0 %v2893_v34  ;;  %2019 = vmatprep.subr.bf16.mxu1 %v3078_v3 }
 0x77e   :  { %v1339_v38 = vpop.f32.mrb[44].mxu0  ;;  %v1380_v40 = vpop.f32.mrb[44].mxu1 }
 0x77f   :  { %v1340_v43 = vadd.f32 %v1339_v38, %v2631_v25  ;;  %v1341_v44 = vpop.f32.mrb[45].mxu0  ;;  %v1997_v45 = vpop.f32.mrb[45].mxu1  ;;  %v1381_v33 = vadd.f32 %v1380_v40, %v2649_v10 }
 0x780   :  { %v1342_v49 = vadd.f32 %v1341_v44, %v2638_v1  ;;  %v1343_v50 = vpop.f32.mrb[46].mxu0  ;;  %v1383_v51 = vpop.f32.mrb[46].mxu1 }
 0x781   :  { %v1386_v53 = vadd.f32 %v1340_v43, %v342_v42  ;;  %v1344_v34 = vpop.f32.mrb[47].mxu0  ;;  %v1998_v54 = vpop.f32.mrb[47].mxu1  ;;  %v2039_v50 = vadd.f32 %v2631_v25, %v2629_v20 }
 0x782   :  { %v1387_v59 = vadd.f32 %v1342_v49, %v344_v48  ;;  %v2041_v34 = vadd.f32 %v2638_v1, %v2636_v52 }
 0x783   :  { %v1723_v58 = vmul.f32 -1.442695, %v1386_v53 }
 0x784   :  { %v1724_v62 = vmul.f32 -1.442695, %v1387_v59 }
 0x785   :  { %2187 = vpow2.f32 %v1723_v58 }
 0x786   :  { %2189 = vpow2.f32 %v1724_v62 }
 0x78f   :  { %v2188_v26 = vpop.eup %2187 }
 0x790   :  { %v1394_v27 = vadd.f32 1.0, %v2188_v26  ;;  %v2190_v29 = vpop.eup %2189 }
 0x791   :  { %v1395_v30 = vadd.f32 1.0, %v2190_v29 }
 0x792   :  { %2191 = vrcp.f32 %v1394_v27 }
 0x793   :  { %2193 = vrcp.f32 %v1395_v30 }
 0x79c   :  { %v2192_v19 = vpop.eup %2191 }
 0x79d   :  { %v1400_v32 = vmul.f32 %v2192_v19, %v1381_v33  ;;  %v2194_v8 = vpop.eup %2193 }
 0x79e   :  { %v1403_v56 = vsub.f32 1.0, %v2194_v8  ;;  %v1405_v55 = vmul.f32 %v2194_v8, %v2906_v61 }
 0x79f   :  { %v1401_v7 = vadd.f32 %v1400_v32, %v3085_v22 }
 0x7a1   :  { %2195 = vtanh.f32 %v1401_v7 }
 0x7ab   :  { %v2196_v23 = vpop.eup %2195 }
 0x7ac   :  { %v1404_v60 = vmul.f32 %v2196_v23, %v1403_v56 }
 0x7ae   :  { %v2990_v38 = vadd.f32 %v1405_v55, %v1404_v60 }
 0x7b0   :  { %v1407_v41 = vpack.c.bf16 %v2990_v38, %v2990_v38 }
 0x7b2   :  { %1409 = vst [vmem:[#allocation9 + $0x18] sm:$0xf] %v1407_v41  ;;  %1449 = vmatmul.mubr.bf16.vlgmr.msra.gmra.mrb[48].mxu0 %v1407_v41  ;;  %2016 = vmatmul.mubr.bf16.vlgmr.msra.gmra.mrb[48].mxu1 %v1407_v41 }
 0x7b3   :  { %1528 = vmatpush1.bf16.msra.mxu0 %v2850_v46  ;;  %2020 = vmatpush3.bf16.msra.mxu1 %v2911_v63  ;;  %v3087_v63 = vld [vmem:[#allocation18_spill] sm:$0xff] }
 0x7b4   :  { %1529 = vmatprep.subr.bf16.mxu0 %v2854_v31  ;;  %2021 = vmatprep.subr.bf16.mxu1 %v3078_v3  ;;  %v3086_v31 = vld [vmem:[#allocation17_spill] sm:$0xff] }
 0x7b5   :  { %1559 = vmatprep.mubr.bf16.mxu0 %v3079_v5  ;;  %2035 = vmatprep.mubr.msk.bf16.mxu1 %vm2344_vm0, %v3078_v3 }
 0x7b7   :  { %1530 = vmatpush1.bf16.msra.mxu0 %v2861_v17  ;;  %2022 = vmatpush3.bf16.msra.mxu1 %v2920_v11  ;;  %v346_v17 = vadd.f32 %v3086_v31, %v2629_v20  ;;  %v348_v11 = vadd.f32 %v3087_v63, %v2636_v52 }
 0x7b8   :  { %1531 = vmatprep.subr.bf16.mxu0 %v2865_v16  ;;  %2023 = vmatprep.subr.bf16.mxu1 %v3078_v3 }
 0x7bb   :  { %1532 = vmatpush1.bf16.msra.mxu0 %v2869_v35  ;;  %2024 = vmatpush3.bf16.msra.mxu1 %v2926_v57 }
 0x7bc   :  { %1533 = vmatprep.subr.bf16.mxu0 %v2929_v28  ;;  %2025 = vmatprep.subr.bf16.mxu1 %v3078_v3 }
 0x7bf   :  { %1534 = vmatpush1.bf16.msra.mxu0 %v2933_v14  ;;  %2026 = vmatpush3.bf16.msra.mxu1 %v2936_v18 }
 0x7c0   :  { %1535 = vmatprep.subr.bf16.mxu0 %v2939_v12  ;;  %2027 = vmatprep.subr.bf16.mxu1 %v3078_v3 }
 0x7c3   :  { %1536 = vmatpush1.bf16.msra.mxu0 %v2943_v4  ;;  %2028 = vmatpush3.bf16.msra.mxu1 %v2946_v2 }
 0x7c4   :  { %1537 = vmatprep.subr.bf16.mxu0 %v2949_v24  ;;  %2029 = vmatprep.subr.bf16.mxu1 %v3078_v3 }
 0x7c7   :  { %1538 = vmatpush1.bf16.msra.mxu0 %v2953_v21  ;;  %2030 = vmatpush3.bf16.msra.mxu1 %v2956_v9 }
 0x7c8   :  { %1539 = vmatprep.subr.bf16.mxu0 %v2959_v6  ;;  %2031 = vmatprep.subr.bf16.mxu1 %v3078_v3 }
 0x7cb   :  { %1540 = vmatpush1.bf16.msra.mxu0 %v2963_v0  ;;  %2032 = vmatpush3.bf16.msra.mxu1 %v2966_v15 }
 0x7cc   :  { %1541 = vmatprep.subr.bf16.mxu0 %v2969_v13  ;;  %2033 = vmatprep.subr.bf16.mxu1 %v3078_v3 }
 0x7cf   :  { %1542 = vmatpush1.bf16.msra.mxu0 %v2973_v36  ;;  %2034 = vmatpush3.bf16.msra.mxu1 %v2976_v37  ;;  %v3088_v37 = vld [vmem:[#allocation21_spill] sm:$0xff] }
 0x885   :  { %v1450_v5 = vpop.f32.mrb[48].mxu0  ;;  %v1491_v46 = vpop.f32.mrb[48].mxu1 }
 0x886   :  { %v1451_v16 = vadd.f32 %v1450_v5, %v2631_v25  ;;  %v1452_v35 = vpop.f32.mrb[49].mxu0  ;;  %v2017_v61 = vpop.f32.mrb[49].mxu1  ;;  %v1492_v15 = vadd.f32 %v1491_v46, %v2649_v10 }
 0x887   :  { %v1453_v57 = vadd.f32 %v1452_v35, %v2638_v1  ;;  %v1454_v28 = vpop.f32.mrb[50].mxu0  ;;  %v1494_v3 = vpop.f32.mrb[50].mxu1 }
 0x888   :  { %v1497_v14 = vadd.f32 %v1451_v16, %v346_v17  ;;  %v1455_v18 = vpop.f32.mrb[51].mxu0  ;;  %v2018_v12 = vpop.f32.mrb[51].mxu1 }
 0x889   :  { %v1498_v4 = vadd.f32 %v1453_v57, %v348_v11 }
 0x88a   :  { %v1725_v2 = vmul.f32 -1.442695, %v1497_v14 }
 0x88b   :  { %v1726_v24 = vmul.f32 -1.442695, %v1498_v4 }
 0x88c   :  { %2197 = vpow2.f32 %v1725_v2 }
 0x88d   :  { %2199 = vpow2.f32 %v1726_v24 }
 0x896   :  { %v2198_v21 = vpop.eup %2197 }
 0x897   :  { %v1505_v9 = vadd.f32 1.0, %v2198_v21  ;;  %v2200_v6 = vpop.eup %2199 }
 0x898   :  { %v1506_v0 = vadd.f32 1.0, %v2200_v6 }
 0x899   :  { %2201 = vrcp.f32 %v1505_v9 }
 0x89a   :  { %2203 = vrcp.f32 %v1506_v0 }
 0x8a3   :  { %v2202_v13 = vpop.eup %2201 }
 0x8a4   :  { %v1511_v36 = vmul.f32 %v2202_v13, %v1492_v15  ;;  %v2204_v42 = vpop.eup %2203 }
 0x8a5   :  { %v1514_v43 = vsub.f32 1.0, %v2204_v42  ;;  %v1516_v47 = vmul.f32 %v2204_v42, %v2990_v38 }
 0x8a6   :  { %v1512_v40 = vadd.f32 %v1511_v36, %v3088_v37 }
 0x8a8   :  { %2205 = vtanh.f32 %v1512_v40 }
 0x8b2   :  { %v2206_v44 = vpop.eup %2205 }
 0x8b3   :  { %v1515_v45 = vmul.f32 %v2206_v44, %v1514_v43 }
 0x8b5   :  { %v1517_v48 = vadd.f32 %v1516_v47, %v1515_v45 }
 0x8b7   :  { %v1518_v49 = vpack.c.bf16 %v1517_v48, %v1517_v48 }
 0x8b9   :  { %1520 = vst [vmem:[#allocation9 + $0x1c] sm:$0xf] %v1518_v49  ;;  %1560 = vmatmul.mubr.bf16.vlgmr.msra.gmra.mrb[16].mxu0 %v1518_v49  ;;  %2036 = vmatmul.mubr.bf16.vlgmr.msra.gmra.mrb[52].mxu1 %v1518_v49 }
 0x98c   :  { %v1561_v51 = vpop.f32.mrb[16].mxu0  ;;  %v1602_v53 = vpop.f32.mrb[52].mxu1 }
 0x98d   :  { %v2040_v54 = vadd.f32 %v2039_v50, %v1561_v51  ;;  %v1563_v59 = vpop.f32.mrb[17].mxu0  ;;  %v2037_v58 = vpop.f32.mrb[53].mxu1  ;;  %v1603_v7 = vadd.f32 %v1602_v53, %v2649_v10 }
 0x98e   :  { %v1565_v62 = vpop.f32.mrb[18].mxu0  ;;  %v1605_v26 = vpop.f32.mrb[54].mxu1  ;;  %v2042_v33 = vadd.f32 %v2041_v34, %v1563_v59 }
 0x98f   :  { %v1727_v27 = vmul.f32 -1.442695, %v2040_v54  ;;  %v1566_v29 = vpop.f32.mrb[19].mxu0  ;;  %v2038_v30 = vpop.f32.mrb[55].mxu1 }
 0x990   :  { %v1728_v19 = vmul.f32 -1.442695, %v2042_v33 }
 0x991   :  { %2207 = vpow2.f32 %v1727_v27 }
 0x992   :  { %2209 = vpow2.f32 %v1728_v19 }
 0x99b   :  { %v2208_v32 = vpop.eup %2207 }
 0x99c   :  { %v1616_v22 = vadd.f32 1.0, %v2208_v32  ;;  %v2210_v20 = vpop.eup %2209 }
 0x99d   :  { %v1617_v25 = vadd.f32 1.0, %v2210_v20 }
 0x99e   :  { %2211 = vrcp.f32 %v1616_v22 }
 0x99f   :  { %2213 = vrcp.f32 %v1617_v25 }
 0x9a8   :  { %v2212_v1 = vpop.eup %2211 }
 0x9a9   :  { %v1622_v52 = vmul.f32 %v2212_v1, %v1603_v7  ;;  %v2214_v56 = vpop.eup %2213 }
 0x9aa   :  { %v1625_v23 = vsub.f32 1.0, %v2214_v56  ;;  %v1627_v38 = vmul.f32 %v2214_v56, %v1517_v48 }
 0x9ab   :  { %v1623_v8 = vadd.f32 %v1622_v52, %v2645_v39 }
 0x9ad   :  { %2215 = vtanh.f32 %v1623_v8 }
 0x9b7   :  { %v2216_v60 = vpop.eup %2215 }
 0x9b8   :  { %v1626_v55 = vmul.f32 %v2216_v60, %v1625_v23 }
 0x9ba   :  { %v1628_v41 = vadd.f32 %v1627_v38, %v1626_v55 }
 0x9bc   :  { %v1629_v5 = vpack.c.bf16 %v1628_v41, %v1628_v41 }
 0x9be   :  { %1631 = vst [vmem:[#allocation9 + $0x20] sm:$0xf] %v1629_v5 }
 0x9bf   :  { %2318 = shalt.err (!%p2315_p0)
}
 0x9c0   :  { %s2319_s12 = scalar_lea.hbm %s3062_s5, 576 }
 0x9c1   :  { %p2320_p1 = scmp.ne.s32.totalorder %s3062_s5, %s2319_s12  ;;  %p2323_p2 = scmp.lt.u32.totalorder %s2319_s12, %s3062_s5 }
 0x9c3   :  { %p2325_p3 = pnand %p2323_p2, %p2320_p1 }
 0x9c5   :  { %2328 = shalt.err (!%p2325_p3)
}
 0x9c6   :  { %1643 = dma.vmem_to_hbm [thread:$0]  %s1638_s8, 576, %s3062_s5, [#allocation5], %s2339_s1, %s2339_s1, %s2340_s17  }
 0x9c7   :  { %2333 = dma.done.wait [#allocation5], 576  }
 0x9c8   :  { %2334 = vsyncadd [#allocation5], 4294966720 }
 0x9c9   :  { %1647 = vsyncpa [#allocation4], 1 }
 0x9ca   :  { %1648 = vsyncpa [#allocation7], 1 }
 0x9cb   :  { %1649 = vsyncpa [#allocation5], 1 }

</bundles_post_ra>
